<compile_context>
chip_gen: v7x
topology: tpu7x:2x2x1
jax: 0.10.0
libtpu: 0.0.40
codegen_flags: <defaults>
</compile_context>

<pallas_src>
import functools

import jax
import jax.numpy as jnp
from jax import lax
from jax.experimental import pallas as pl
from jax.experimental.pallas import tpu as pltpu


def _round_up(x, m):
    return ((x + m - 1) // m) * m


def _vmem_capacity_bytes():
    """Per-core VMEM capacity; conservative 64 MiB (v7x) fallback."""
    try:
        info = pltpu.get_tpu_info()
        for attr in ("vmem_capacity_bytes", "vmem_size_bytes", "vmem_bytes"):
            v = getattr(info, attr, None)
            if v:
                return int(v)
    except Exception:
        pass
    return 64 * 1024 * 1024


def _vmem_bytes(th, W, cin, coutp, K, pad, out_itemsize, use_im2col, kkc_p):
    """Per-grid-step VMEM estimate: double-buffered I/O + scratch + f32 temps."""
    bf16 = 2
    m = th * W
    b = 0
    b += 2 * m * cin * bf16                       # main input block (x2 buffers)
    b += 2 * 2 * pad * W * cin * bf16             # top + bottom halo blocks (x2)
    b += 2 * kkc_p * coutp * bf16                 # weights (conservatively x2)
    b += 2 * coutp * 4                            # bias
    b += 2 * m * coutp * out_itemsize             # output block (x2 buffers)
    b += (th + 2 * pad) * (W + 2 * pad) * cin * bf16   # haloed-tile scratch
    b += m * cin * bf16                           # strided-slab reshape copy temp
    if use_im2col:
        b += m * kkc_p * bf16                     # col scratch
        b += 2 * m * coutp * 4                    # f32 dot result + epilogue temp
    else:
        b += m * coutp * 4                        # f32 accumulator scratch
        b += 2 * m * coutp * 4                    # per-tap dot result + epilogue temp
    return b


def _choose_tile_h(H, pad, fits, *, max_tile_h=256, min_h_tiles=1):
    cands = [th for th in range(1, min(H, max_tile_h) + 1)
             if H % th == 0 and th % pad == 0]
    if not cands:
        raise ValueError("no legal tile_h: need H %% (kernel_size//2) == 0")
    fitting = [th for th in cands if fits(th)]
    pool = fitting if fitting else cands[:1]      # smallest legal if nothing fits
    pref = [th for th in pool if H // th >= min_h_tiles]   # megacore balance
    return max(pref) if pref else max(pool)


def _bblock_kernel(main_ref, top_ref, bot_ref, w_ref, b_ref, o_ref,
                   xtile, work, *, TH, W, K, pad, res_scale, use_im2col):
    """One (batch, H-tile) step.

    main_ref: (1, TH, W, Cin)          bf16
    top_ref : (1, pad, W, Cin)         bf16 (rows above the tile, clamped)
    bot_ref : (1, pad, W, Cin)         bf16 (rows below the tile, clamped)
    w_ref   : (kkc_p, Coutp)           bf16
    b_ref   : (1, Coutp)               f32
    o_ref   : (1, TH, W, Coutp)        out dtype
    xtile   : (TH+2p, W+2p, Cin)       bf16 VMEM scratch (zero-framed input tile)
    work    : im2col -> (TH*W, kkc_p) bf16 ; no-im2col -> (TH*W, Coutp) f32 acc
    """
    h = pl.program_id(1)
    nh = pl.num_programs(1)
    cin = main_ref.shape[-1]
    coutp = o_ref.shape[-1]
    kkc = K * K * cin
    kkc_p = w_ref.shape[0]

    # ---- assemble the zero-framed input tile in VMEM -------------------------
    # Left/right zero columns are rewritten every step (cheap) because hoisting
    # under @pl.when(first step) is unsafe with per-core scratch on megacore.
    zcol = jnp.zeros((TH + 2 * pad, pad, cin), dtype=xtile.dtype)
    xtile[:, 0:pad, :] = zcol
    xtile[:, pad + W:pad + W + pad, :] = zcol
    xtile[pad:pad + TH, pad:pad + W, :] = main_ref[0]

    zrow = jnp.zeros((pad, W, cin), dtype=xtile.dtype)

    @pl.when(h > 0)
    def _():
        xtile[0:pad, pad:pad + W, :] = top_ref[0]

    @pl.when(h == 0)
    def _():
        xtile[0:pad, pad:pad + W, :] = zrow

    @pl.when(h < nh - 1)
    def _():
        xtile[pad + TH:pad + TH + pad, pad:pad + W, :] = bot_ref[0]

    @pl.when(h == nh - 1)
    def _():
        xtile[pad + TH:pad + TH + pad, pad:pad + W, :] = zrow

    # ---- matmul ---------------------------------------------------------------
    if use_im2col:
        # Small-Cin path: im2col into a kkc_p (multiple of 128) wide scratch,
        # then ONE MXU contraction over the full K*K*Cin depth.
        col = work
        for ky in range(K):
            for kx in range(K):
                t = ky * K + kx
                col[:, t * cin:(t + 1) * cin] = (
                    xtile[ky:ky + TH, kx:kx + W, :].reshape(TH * W, cin))
        if kkc_p > kkc:
            # Zero the padded tail so no stale VMEM reaches the MXU
            # (matching weight rows are also zero).
            col[:, kkc:kkc_p] = jnp.zeros((TH * W, kkc_p - kkc), dtype=col.dtype)
        acc = jnp.dot(col[...], w_ref[...], preferred_element_type=jnp.float32)
    else:
        # Deep-layer path (Cin >= 128): no im2col; K*K accumulating matmuls that
        # contract Cin directly on static xtile slices, into an f32 VMEM acc.
        acc_ref = work
        for ky in range(K):
            for kx in range(K):
                t = ky * K + kx
                lhs = xtile[ky:ky + TH, kx:kx + W, :].reshape(TH * W, cin)
                part = jnp.dot(lhs, w_ref[t * cin:(t + 1) * cin, :],
                               preferred_element_type=jnp.float32)
                if t == 0:
                    acc_ref[...] = part
                else:
                    acc_ref[...] += part
        acc = acc_ref[...]

    # ---- epilogue in f32: bias -> ReLU -> res_scale ---------------------------
    acc = acc + b_ref[...].astype(jnp.float32)
    acc = jnp.maximum(acc, 0.0)                 # act = nn.ReLU(True)
    if res_scale != 1.0:                        # .mul(self.res_scale)
        acc = acc * jnp.float32(res_scale)

    o_ref[...] = acc.reshape(1, TH, W, coutp).astype(o_ref.dtype)


def bblock_forward(x, weight, bias, *, res_scale=1.0, tile_h=None,
                   out_dtype=None, use_im2col=None,
                   nhwc_input=False, nhwc_output=False):
    """BBlock forward.

    x      : (N, Cin, H, W) [default] or (N, H, W, Cin) if nhwc_input=True
    weight : (Cout, Cin, K, K) PyTorch layout
    bias   : (Cout,)
    Returns (N, Cout, H, W) (or (N, H, W, Cout) if nhwc_output=True).
    """
    if nhwc_input:
        N, H, W, Cin = x.shape
    else:
        N, Cin, H, W = x.shape
    Cout, cin_w, K, k2 = weight.shape
    assert cin_w == Cin and K == k2
    # default_conv uses padding = kernel_size // 2 ('same' only for odd K).
    assert K % 2 == 1 and K >= 3, "kernel_size must be odd and >= 3"
    # TODO(synk): kernel_size == 1 degenerates to a plain matmul; add if needed.
    pad = K // 2
    if H % pad != 0:
        # Limitation: halo BlockSpecs tile H in `pad`-row blocks.
        raise ValueError("H must be divisible by kernel_size // 2 "
                         f"(H={H}, kernel_size={K})")

    if out_dtype is None:
        out_dtype = x.dtype
    out_dtype = jnp.dtype(out_dtype)
    out_itemsize = out_dtype.itemsize

    if use_im2col is None:
        use_im2col = Cin < 128                      # deep layers skip im2col

    kkc = K * K * Cin
    kkc_p = _round_up(kkc, 128) if use_im2col else kkc
    coutp = _round_up(Cout, 128)                    # lane-dense output stores

    # Generation-aware VMEM budget (v5e/v6e: 128 MiB -> ~70/96 MiB; v7x: 64 -> 35/48).
    cap = _vmem_capacity_bytes()
    budget = int(0.55 * cap)
    vmem_limit = min(int(0.75 * cap), 112 * 1024 * 1024)

    if tile_h is None:
        fits = lambda th: _vmem_bytes(th, W, Cin, coutp, K, pad, out_itemsize,
                                      use_im2col, kkc_p) <= budget
        # With N == 1, prefer >= 2 H-tiles so both v7x TensorCores get work.
        tile_h = _choose_tile_h(H, pad, fits, min_h_tiles=2 if N == 1 else 1)
    assert H % tile_h == 0 and tile_h % pad == 0
    n_h = H // tile_h

    # Layout / dtype prep: one fused transpose+cast pass; no spatial pad of x.
    if nhwc_input:
        xh = x.astype(jnp.bfloat16)
    else:
        xh = jnp.transpose(x, (0, 2, 3, 1)).astype(jnp.bfloat16)        # NHWC bf16
    # (Cout, Cin, K, K) -> (K, K, Cin, Cout) -> (kkc, Cout) -> pad to (kkc_p, coutp).
    w = jnp.transpose(weight, (2, 3, 1, 0)).reshape(kkc, Cout)
    w = jnp.pad(w, ((0, kkc_p - kkc), (0, coutp - Cout))).astype(jnp.bfloat16)
    b = jnp.pad(bias.astype(jnp.float32), (0, coutp - Cout)).reshape(1, coutp)

    th_over_pad = tile_h // pad
    h_blocks_pad = H // pad

    def main_map(n, h):
        return (n, h, 0, 0)

    def top_map(n, h):      # rows [h*TH - pad, h*TH); clamped, masked in-kernel
        return (n, jnp.maximum(h * th_over_pad - 1, 0), 0, 0)

    def bot_map(n, h):      # rows [h*TH + TH, +pad); clamped, masked in-kernel
        return (n, jnp.minimum((h + 1) * th_over_pad, h_blocks_pad - 1), 0, 0)

    kern = functools.partial(_bblock_kernel, TH=tile_h, W=W, K=K, pad=pad,
                             res_scale=float(res_scale), use_im2col=use_im2col)

    scratch = [pltpu.VMEM((tile_h + 2 * pad, W + 2 * pad, Cin), jnp.bfloat16)]
    if use_im2col:
        scratch.append(pltpu.VMEM((tile_h * W, kkc_p), jnp.bfloat16))
    else:
        scratch.append(pltpu.VMEM((tile_h * W, coutp), jnp.float32))

    flops = 2 * N * H * W * kkc_p * coutp
    bytes_accessed = (xh.size * 2) + (w.size * 2) + (b.size * 4) \
        + (N * H * W * coutp * out_itemsize)

    out_p = pl.pallas_call(
        kern,
        out_shape=jax.ShapeDtypeStruct((N, H, W, coutp), out_dtype),
        grid=(N, n_h),
        in_specs=[
            pl.BlockSpec((1, tile_h, W, Cin), main_map),
            pl.BlockSpec((1, pad, W, Cin), top_map),
            pl.BlockSpec((1, pad, W, Cin), bot_map),
            pl.BlockSpec((kkc_p, coutp), lambda n, h: (0, 0)),
            pl.BlockSpec((1, coutp), lambda n, h: (0, 0)),
        ],
        out_specs=pl.BlockSpec((1, tile_h, W, coutp), main_map),
        scratch_shapes=scratch,
        compiler_params=pltpu.CompilerParams(
            dimension_semantics=("parallel", "parallel"),
            vmem_limit_bytes=vmem_limit,
        ),
        cost_estimate=pl.CostEstimate(
            flops=flops, transcendentals=0, bytes_accessed=bytes_accessed),
    )(xh, xh, xh, w, b)

    out = out_p[..., :Cout]
    if nhwc_output:
        return out
    # TODO(synk): keep the surrounding fastMRI model NHWC (nhwc_input/nhwc_output)
    #             to drop this per-layer transpose entirely.
    return jnp.transpose(out, (0, 3, 1, 2))


def _reference(x_nchw, weight, bias, res_scale):
    """Pure-JAX reference with bf16-rounded operands (mirrors the kernel's MXU
    operand precision; accumulation is f32 in both), keeping tolerances tight."""
    K = weight.shape[-1]
    pad = K // 2
    xb = x_nchw.astype(jnp.bfloat16).astype(jnp.float32)
    wb = weight.astype(jnp.bfloat16).astype(jnp.float32)
    y = lax.conv_general_dilated(
        xb, wb, window_strides=(1, 1),
        padding=((pad, pad), (pad, pad)),
        dimension_numbers=("NCHW", "OIHW", "NCHW"),
        preferred_element_type=jnp.float32)
    y = y + bias[None, :, None, None]
    return jnp.maximum(y, 0.0) * res_scale


if __name__ == "__main__":
    key = jax.random.PRNGKey(0)
    k1, k2, k3, k4 = jax.random.split(key, 4)

    def make(N, Cin, Cout, H, W, K, k):
        ka, kb, kc = jax.random.split(k, 3)
        x = jax.random.normal(ka, (N, Cin, H, W), dtype=jnp.float32)
        w = 0.1 * jax.random.normal(kb, (Cout, Cin, K, K), dtype=jnp.float32)
        b = 0.1 * jax.random.normal(kc, (Cout,), dtype=jnp.float32)
        return x, w, b

    # Case 1: small-Cin im2col path (kkc padded to 128), K=3, two H-tiles.
    x, w, b = make(2, 4, 8, 16, 16, 3, k1)
    out = jax.block_until_ready(bblock_forward(x, w, b, res_scale=1.0, tile_h=8))
    ref = _reference(x, w, b, 1.0)
    assert out.shape == (2, 8, 16, 16), out.shape
    assert jnp.allclose(out, ref, atol=1e-3, rtol=1e-3), \
        float(jnp.max(jnp.abs(out - ref)))

    # Case 2: K=5 (pad=2) halos, N=1 (megacore tile-split preference), res_scale=0.5.
    x, w, b = make(1, 4, 8, 16, 16, 5, k2)
    out = jax.block_until_ready(bblock_forward(x, w, b, res_scale=0.5))
    ref = _reference(x, w, b, 0.5)
    assert out.shape == (1, 8, 16, 16), out.shape
    assert jnp.allclose(out, ref, atol=1e-3, rtol=1e-3), \
        float(jnp.max(jnp.abs(out - ref)))

    # Case 3: deep-layer path (Cin >= 128): K*K accumulating matmuls, no im2col.
    x, w, b = make(1, 128, 16, 16, 16, 3, k3)
    out = jax.block_until_ready(bblock_forward(x, w, b, res_scale=1.0))
    ref = _reference(x, w, b, 1.0)
    assert out.shape == (1, 16, 16, 16), out.shape
    assert jnp.allclose(out, ref, atol=2e-3, rtol=2e-3), \
        float(jnp.max(jnp.abs(out - ref)))

    # Case 4: bf16 output + NHWC in/out (layout-chaining path, no transposes).
    x, w, b = make(2, 4, 8, 16, 16, 3, k4)
    x_nhwc = jnp.transpose(x, (0, 2, 3, 1))
    out_nhwc = jax.block_until_ready(
        bblock_forward(x_nhwc, w, b, res_scale=0.5, out_dtype=jnp.bfloat16,
                       nhwc_input=True, nhwc_output=True))
    ref_nhwc = jnp.transpose(_reference(x, w, b, 0.5), (0, 2, 3, 1))
    assert out_nhwc.shape == (2, 16, 16, 8) and out_nhwc.dtype == jnp.bfloat16
    assert jnp.allclose(out_nhwc.astype(jnp.float32), ref_nhwc,
                        atol=3e-2, rtol=3e-2), \
        float(jnp.max(jnp.abs(out_nhwc.astype(jnp.float32) - ref_nhwc)))

    print("KERNEL_OK")
</pallas_src>

<mosaic_0001>
module attributes {stable_mosaic.version = 11 : i64} {
  func.func @_bblock_kernel(%arg0: i32, %arg1: i32, %arg2: memref<1x8x16x4xbf16, #tpu.memory_space<vmem>>, %arg3: memref<1x1x16x4xbf16, #tpu.memory_space<vmem>>, %arg4: memref<1x1x16x4xbf16, #tpu.memory_space<vmem>>, %arg5: memref<128x128xbf16, #tpu.memory_space<vmem>>, %arg6: memref<1x128xf32, #tpu.memory_space<vmem>>, %arg7: memref<1x8x16x128xf32, #tpu.memory_space<vmem>>, %arg8: memref<10x18x4xbf16, #tpu.memory_space<vmem>>, %arg9: memref<128x128xbf16, #tpu.memory_space<vmem>>) attributes {dimension_semantics = [#tpu.dimension_semantics<parallel>, #tpu.dimension_semantics<parallel>], iteration_bounds = array<i64: 2, 2>, scalar_prefetch = 0 : i64, scratch_operands = 2 : i64, tpu.core_type = #tpu.core_type<tc>, window_params = [{transform_indices = @transform_0, window_bounds = array<i64: 1, 8, 16, 4>}, {transform_indices = @transform_1, window_bounds = array<i64: 1, 1, 16, 4>}, {transform_indices = @transform_2, window_bounds = array<i64: 1, 1, 16, 4>}, {pipeline_mode = #tpu.pipeline_mode<synchronous>, transform_indices = @transform_3, window_bounds = array<i64: 128, 128>}, {pipeline_mode = #tpu.pipeline_mode<synchronous>, transform_indices = @transform_4, window_bounds = array<i64: 1, 128>}, {transform_indices = @transform_5, window_bounds = array<i64: 1, 8, 16, 128>}]} {
    %cst = arith.constant 0.000000e+00 : bf16
    %0 = vector.broadcast %cst : bf16 to vector<10x1x4xbf16>
    %c0 = arith.constant 0 : index
    %c0_0 = arith.constant 0 : index
    %c0_1 = arith.constant 0 : index
    %1 = vector.load %arg8[%c0, %c0_0, %c0_1] : memref<10x18x4xbf16, #tpu.memory_space<vmem>>, vector<10x1x4xbf16>
    tpu.vector_store %arg8[%c0, %c0_0, %c0_1], %0 {strides = array<i32>} : memref<10x18x4xbf16, #tpu.memory_space<vmem>>, vector<10x1x4xbf16>,
    %c0_2 = arith.constant 0 : index
    %c17 = arith.constant 17 : index
    %c0_3 = arith.constant 0 : index
    %2 = vector.load %arg8[%c0_2, %c17, %c0_3] : memref<10x18x4xbf16, #tpu.memory_space<vmem>>, vector<10x1x4xbf16>
    tpu.vector_store %arg8[%c0_2, %c17, %c0_3], %0 {strides = array<i32>} : memref<10x18x4xbf16, #tpu.memory_space<vmem>>, vector<10x1x4xbf16>,
    %c0_4 = arith.constant 0 : index
    %c0_5 = arith.constant 0 : index
    %c0_6 = arith.constant 0 : index
    %c0_7 = arith.constant 0 : index
    %3 = vector.load %arg2[%c0_4, %c0_5, %c0_6, %c0_7] : memref<1x8x16x4xbf16, #tpu.memory_space<vmem>>, vector<1x8x16x4xbf16>
    %4 = vector.shape_cast %3 : vector<1x8x16x4xbf16> to vector<8x16x4xbf16>
    %c1 = arith.constant 1 : index
    %c1_8 = arith.constant 1 : index
    %c0_9 = arith.constant 0 : index
    %5 = vector.load %arg8[%c1, %c1_8, %c0_9] : memref<10x18x4xbf16, #tpu.memory_space<vmem>>, vector<8x16x4xbf16>
    tpu.vector_store %arg8[%c1, %c1_8, %c0_9], %4 {strides = array<i32>} : memref<10x18x4xbf16, #tpu.memory_space<vmem>>, vector<8x16x4xbf16>,
    %cst_10 = arith.constant 0.000000e+00 : bf16
    %6 = vector.broadcast %cst_10 : bf16 to vector<1x16x4xbf16>
    %c0_i32 = arith.constant 0 : i32
    %7 = arith.cmpi sgt, %arg1, %c0_i32 : i32
    %8 = arith.extui %7 : i1 to i32
    %c0_i32_11 = arith.constant 0 : i32
    %9 = arith.cmpi ne, %8, %c0_i32_11 : i32
    scf.if %9 {
      %c0_67 = arith.constant 0 : index
      %c0_68 = arith.constant 0 : index
      %c0_69 = arith.constant 0 : index
      %c0_70 = arith.constant 0 : index
      %58 = vector.load %arg3[%c0_67, %c0_68, %c0_69, %c0_70] : memref<1x1x16x4xbf16, #tpu.memory_space<vmem>>, vector<1x1x16x4xbf16>
      %59 = vector.shape_cast %58 : vector<1x1x16x4xbf16> to vector<1x16x4xbf16>
      %c0_71 = arith.constant 0 : index
      %c1_72 = arith.constant 1 : index
      %c0_73 = arith.constant 0 : index
      %60 = vector.load %arg8[%c0_71, %c1_72, %c0_73] : memref<10x18x4xbf16, #tpu.memory_space<vmem>>, vector<1x16x4xbf16>
      tpu.vector_store %arg8[%c0_71, %c1_72, %c0_73], %59 {strides = array<i32>} : memref<10x18x4xbf16, #tpu.memory_space<vmem>>, vector<1x16x4xbf16>,
    } else {
    }
    %c0_i32_12 = arith.constant 0 : i32
    %10 = arith.cmpi eq, %arg1, %c0_i32_12 : i32
    %11 = arith.extui %10 : i1 to i32
    %c0_i32_13 = arith.constant 0 : i32
    %12 = arith.cmpi ne, %11, %c0_i32_13 : i32
    scf.if %12 {
      %c0_67 = arith.constant 0 : index
      %c1_68 = arith.constant 1 : index
      %c0_69 = arith.constant 0 : index
      %58 = vector.load %arg8[%c0_67, %c1_68, %c0_69] : memref<10x18x4xbf16, #tpu.memory_space<vmem>>, vector<1x16x4xbf16>
      tpu.vector_store %arg8[%c0_67, %c1_68, %c0_69], %6 {strides = array<i32>} : memref<10x18x4xbf16, #tpu.memory_space<vmem>>, vector<1x16x4xbf16>,
    } else {
    }
    %c1_i32 = arith.constant 1 : i32
    %13 = arith.cmpi slt, %arg1, %c1_i32 : i32
    %14 = arith.extui %13 : i1 to i32
    %c0_i32_14 = arith.constant 0 : i32
    %15 = arith.cmpi ne, %14, %c0_i32_14 : i32
    scf.if %15 {
      %c0_67 = arith.constant 0 : index
      %c0_68 = arith.constant 0 : index
      %c0_69 = arith.constant 0 : index
      %c0_70 = arith.constant 0 : index
      %58 = vector.load %arg4[%c0_67, %c0_68, %c0_69, %c0_70] : memref<1x1x16x4xbf16, #tpu.memory_space<vmem>>, vector<1x1x16x4xbf16>
      %59 = vector.shape_cast %58 : vector<1x1x16x4xbf16> to vector<1x16x4xbf16>
      %c9 = arith.constant 9 : index
      %c1_71 = arith.constant 1 : index
      %c0_72 = arith.constant 0 : index
      %60 = vector.load %arg8[%c9, %c1_71, %c0_72] : memref<10x18x4xbf16, #tpu.memory_space<vmem>>, vector<1x16x4xbf16>
      tpu.vector_store %arg8[%c9, %c1_71, %c0_72], %59 {strides = array<i32>} : memref<10x18x4xbf16, #tpu.memory_space<vmem>>, vector<1x16x4xbf16>,
    } else {
    }
    %c1_i32_15 = arith.constant 1 : i32
    %16 = arith.cmpi eq, %arg1, %c1_i32_15 : i32
    %17 = arith.extui %16 : i1 to i32
    %c0_i32_16 = arith.constant 0 : i32
    %18 = arith.cmpi ne, %17, %c0_i32_16 : i32
    scf.if %18 {
      %c9 = arith.constant 9 : index
      %c1_67 = arith.constant 1 : index
      %c0_68 = arith.constant 0 : index
      %58 = vector.load %arg8[%c9, %c1_67, %c0_68] : memref<10x18x4xbf16, #tpu.memory_space<vmem>>, vector<1x16x4xbf16>
      tpu.vector_store %arg8[%c9, %c1_67, %c0_68], %6 {strides = array<i32>} : memref<10x18x4xbf16, #tpu.memory_space<vmem>>, vector<1x16x4xbf16>,
    } else {
    }
    %c0_17 = arith.constant 0 : index
    %c0_18 = arith.constant 0 : index
    %c0_19 = arith.constant 0 : index
    %19 = vector.load %arg8[%c0_17, %c0_18, %c0_19] : memref<10x18x4xbf16, #tpu.memory_space<vmem>>, vector<8x16x4xbf16>
    %20 = vector.shape_cast %19 : vector<8x16x4xbf16> to vector<128x4xbf16>
    %c0_20 = arith.constant 0 : index
    %c0_21 = arith.constant 0 : index
    %21 = vector.load %arg9[%c0_20, %c0_21] : memref<128x128xbf16, #tpu.memory_space<vmem>>, vector<128x4xbf16>
    tpu.vector_store %arg9[%c0_20, %c0_21], %20 {strides = array<i32>} : memref<128x128xbf16, #tpu.memory_space<vmem>>, vector<128x4xbf16>,
    %c0_22 = arith.constant 0 : index
    %c1_23 = arith.constant 1 : index
    %c0_24 = arith.constant 0 : index
    %22 = vector.load %arg8[%c0_22, %c1_23, %c0_24] : memref<10x18x4xbf16, #tpu.memory_space<vmem>>, vector<8x16x4xbf16>
    %23 = vector.shape_cast %22 : vector<8x16x4xbf16> to vector<128x4xbf16>
    %c0_25 = arith.constant 0 : index
    %c4 = arith.constant 4 : index
    %24 = vector.load %arg9[%c0_25, %c4] : memref<128x128xbf16, #tpu.memory_space<vmem>>, vector<128x4xbf16>
    tpu.vector_store %arg9[%c0_25, %c4], %23 {strides = array<i32>} : memref<128x128xbf16, #tpu.memory_space<vmem>>, vector<128x4xbf16>,
    %c0_26 = arith.constant 0 : index
    %c2 = arith.constant 2 : index
    %c0_27 = arith.constant 0 : index
    %25 = vector.load %arg8[%c0_26, %c2, %c0_27] : memref<10x18x4xbf16, #tpu.memory_space<vmem>>, vector<8x16x4xbf16>
    %26 = vector.shape_cast %25 : vector<8x16x4xbf16> to vector<128x4xbf16>
    %c0_28 = arith.constant 0 : index
    %c8 = arith.constant 8 : index
    %27 = vector.load %arg9[%c0_28, %c8] : memref<128x128xbf16, #tpu.memory_space<vmem>>, vector<128x4xbf16>
    tpu.vector_store %arg9[%c0_28, %c8], %26 {strides = array<i32>} : memref<128x128xbf16, #tpu.memory_space<vmem>>, vector<128x4xbf16>,
    %c1_29 = arith.constant 1 : index
    %c0_30 = arith.constant 0 : index
    %c0_31 = arith.constant 0 : index
    %28 = vector.load %arg8[%c1_29, %c0_30, %c0_31] : memref<10x18x4xbf16, #tpu.memory_space<vmem>>, vector<8x16x4xbf16>
    %29 = vector.shape_cast %28 : vector<8x16x4xbf16> to vector<128x4xbf16>
    %c0_32 = arith.constant 0 : index
    %c12 = arith.constant 12 : index
    %30 = vector.load %arg9[%c0_32, %c12] : memref<128x128xbf16, #tpu.memory_space<vmem>>, vector<128x4xbf16>
    tpu.vector_store %arg9[%c0_32, %c12], %29 {strides = array<i32>} : memref<128x128xbf16, #tpu.memory_space<vmem>>, vector<128x4xbf16>,
    %c1_33 = arith.constant 1 : index
    %c1_34 = arith.constant 1 : index
    %c0_35 = arith.constant 0 : index
    %31 = vector.load %arg8[%c1_33, %c1_34, %c0_35] : memref<10x18x4xbf16, #tpu.memory_space<vmem>>, vector<8x16x4xbf16>
    %32 = vector.shape_cast %31 : vector<8x16x4xbf16> to vector<128x4xbf16>
    %c0_36 = arith.constant 0 : index
    %c16 = arith.constant 16 : index
    %33 = vector.load %arg9[%c0_36, %c16] : memref<128x128xbf16, #tpu.memory_space<vmem>>, vector<128x4xbf16>
    tpu.vector_store %arg9[%c0_36, %c16], %32 {strides = array<i32>} : memref<128x128xbf16, #tpu.memory_space<vmem>>, vector<128x4xbf16>,
    %c1_37 = arith.constant 1 : index
    %c2_38 = arith.constant 2 : index
    %c0_39 = arith.constant 0 : index
    %34 = vector.load %arg8[%c1_37, %c2_38, %c0_39] : memref<10x18x4xbf16, #tpu.memory_space<vmem>>, vector<8x16x4xbf16>
    %35 = vector.shape_cast %34 : vector<8x16x4xbf16> to vector<128x4xbf16>
    %c0_40 = arith.constant 0 : index
    %c20 = arith.constant 20 : index
    %36 = vector.load %arg9[%c0_40, %c20] : memref<128x128xbf16, #tpu.memory_space<vmem>>, vector<128x4xbf16>
    tpu.vector_store %arg9[%c0_40, %c20], %35 {strides = array<i32>} : memref<128x128xbf16, #tpu.memory_space<vmem>>, vector<128x4xbf16>,
    %c2_41 = arith.constant 2 : index
    %c0_42 = arith.constant 0 : index
    %c0_43 = arith.constant 0 : index
    %37 = vector.load %arg8[%c2_41, %c0_42, %c0_43] : memref<10x18x4xbf16, #tpu.memory_space<vmem>>, vector<8x16x4xbf16>
    %38 = vector.shape_cast %37 : vector<8x16x4xbf16> to vector<128x4xbf16>
    %c0_44 = arith.constant 0 : index
    %c24 = arith.constant 24 : index
    %39 = vector.load %arg9[%c0_44, %c24] : memref<128x128xbf16, #tpu.memory_space<vmem>>, vector<128x4xbf16>
    tpu.vector_store %arg9[%c0_44, %c24], %38 {strides = array<i32>} : memref<128x128xbf16, #tpu.memory_space<vmem>>, vector<128x4xbf16>,
    %c2_45 = arith.constant 2 : index
    %c1_46 = arith.constant 1 : index
    %c0_47 = arith.constant 0 : index
    %40 = vector.load %arg8[%c2_45, %c1_46, %c0_47] : memref<10x18x4xbf16, #tpu.memory_space<vmem>>, vector<8x16x4xbf16>
    %41 = vector.shape_cast %40 : vector<8x16x4xbf16> to vector<128x4xbf16>
    %c0_48 = arith.constant 0 : index
    %c28 = arith.constant 28 : index
    %42 = vector.load %arg9[%c0_48, %c28] : memref<128x128xbf16, #tpu.memory_space<vmem>>, vector<128x4xbf16>
    tpu.vector_store %arg9[%c0_48, %c28], %41 {strides = array<i32>} : memref<128x128xbf16, #tpu.memory_space<vmem>>, vector<128x4xbf16>,
    %c2_49 = arith.constant 2 : index
    %c2_50 = arith.constant 2 : index
    %c0_51 = arith.constant 0 : index
    %43 = vector.load %arg8[%c2_49, %c2_50, %c0_51] : memref<10x18x4xbf16, #tpu.memory_space<vmem>>, vector<8x16x4xbf16>
    %44 = vector.shape_cast %43 : vector<8x16x4xbf16> to vector<128x4xbf16>
    %c0_52 = arith.constant 0 : index
    %c32 = arith.constant 32 : index
    %45 = vector.load %arg9[%c0_52, %c32] : memref<128x128xbf16, #tpu.memory_space<vmem>>, vector<128x4xbf16>
    tpu.vector_store %arg9[%c0_52, %c32], %44 {strides = array<i32>} : memref<128x128xbf16, #tpu.memory_space<vmem>>, vector<128x4xbf16>,
    %cst_53 = arith.constant 0.000000e+00 : bf16
    %46 = vector.broadcast %cst_53 : bf16 to vector<128x92xbf16>
    %c0_54 = arith.constant 0 : index
    %c36 = arith.constant 36 : index
    %47 = vector.load %arg9[%c0_54, %c36] : memref<128x128xbf16, #tpu.memory_space<vmem>>, vector<128x92xbf16>
    tpu.vector_store %arg9[%c0_54, %c36], %46 {strides = array<i32>} : memref<128x128xbf16, #tpu.memory_space<vmem>>, vector<128x92xbf16>,
    %c0_55 = arith.constant 0 : index
    %c0_56 = arith.constant 0 : index
    %48 = vector.load %arg9[%c0_55, %c0_56] : memref<128x128xbf16, #tpu.memory_space<vmem>>, vector<128x128xbf16>
    %c0_57 = arith.constant 0 : index
    %c0_58 = arith.constant 0 : index
    %49 = vector.load %arg5[%c0_57, %c0_58] : memref<128x128xbf16, #tpu.memory_space<vmem>>, vector<128x128xbf16>
    %cst_59 = arith.constant dense<0.000000e+00> : vector<128x128xf32>
    %50 = tpu.matmul %48, %49, %cst_59 {dimension_numbers = #tpu.dot_dimension_numbers<[1], [0], [0], [1], [0, 0, 1, 1], [], []>} : vector<128x128xbf16>, vector<128x128xbf16>, vector<128x128xf32> -> vector<128x128xf32>
    %c0_60 = arith.constant 0 : index
    %c0_61 = arith.constant 0 : index
    %51 = vector.load %arg6[%c0_60, %c0_61] : memref<1x128xf32, #tpu.memory_space<vmem>>, vector<1x128xf32>
    %52 = vector.broadcast %51 : vector<1x128xf32> to vector<128x128xf32>
    %53 = arith.addf %50, %52 : vector<128x128xf32>
    %cst_62 = arith.constant 0.000000e+00 : f32
    %54 = vector.broadcast %cst_62 : f32 to vector<128x128xf32>
    %55 = arith.maximumf %53, %54 : vector<128x128xf32>
    %56 = vector.shape_cast %55 : vector<128x128xf32> to vector<1x8x16x128xf32>
    %c0_63 = arith.constant 0 : index
    %c0_64 = arith.constant 0 : index
    %c0_65 = arith.constant 0 : index
    %c0_66 = arith.constant 0 : index
    %57 = vector.load %arg7[%c0_63, %c0_64, %c0_65, %c0_66] : memref<1x8x16x128xf32, #tpu.memory_space<vmem>>, vector<1x8x16x128xf32>
    tpu.vector_store %arg7[%c0_63, %c0_64, %c0_65, %c0_66], %56 {strides = array<i32>} : memref<1x8x16x128xf32, #tpu.memory_space<vmem>>, vector<1x8x16x128xf32>,
    return
  }
  func.func @transform_0(%arg0: i32, %arg1: i32) -> (i32, i32, i32, i32) {
    %c0_i32 = arith.constant 0 : i32
    %c0_i32_0 = arith.constant 0 : i32
    %c0_i32_1 = arith.constant 0 : i32
    return %arg0, %arg1, %c0_i32, %c0_i32_0 : i32, i32, i32, i32
  }
  func.func @transform_1(%arg0: i32, %arg1: i32) -> (i32, i32, i32, i32) {
    %c8_i32 = arith.constant 8 : i32
    %0 = arith.muli %arg1, %c8_i32 : i32
    %c1_i32 = arith.constant 1 : i32
    %1 = arith.subi %0, %c1_i32 : i32
    %c0_i32 = arith.constant 0 : i32
    %2 = arith.maxsi %1, %c0_i32 : i32
    %c0_i32_0 = arith.constant 0 : i32
    %c0_i32_1 = arith.constant 0 : i32
    %c0_i32_2 = arith.constant 0 : i32
    return %arg0, %2, %c0_i32_0, %c0_i32_1 : i32, i32, i32, i32
  }
  func.func @transform_2(%arg0: i32, %arg1: i32) -> (i32, i32, i32, i32) {
    %c1_i32 = arith.constant 1 : i32
    %0 = arith.addi %arg1, %c1_i32 : i32
    %c8_i32 = arith.constant 8 : i32
    %1 = arith.muli %0, %c8_i32 : i32
    %c15_i32 = arith.constant 15 : i32
    %2 = arith.minsi %1, %c15_i32 : i32
    %c0_i32 = arith.constant 0 : i32
    %c0_i32_0 = arith.constant 0 : i32
    %c0_i32_1 = arith.constant 0 : i32
    return %arg0, %2, %c0_i32, %c0_i32_0 : i32, i32, i32, i32
  }
  func.func @transform_3(%arg0: i32, %arg1: i32) -> (i32, i32) {
    %c0_i32 = arith.constant 0 : i32
    %c0_i32_0 = arith.constant 0 : i32
    %c0_i32_1 = arith.constant 0 : i32
    return %c0_i32, %c0_i32_0 : i32, i32
  }
  func.func @transform_4(%arg0: i32, %arg1: i32) -> (i32, i32) {
    %c0_i32 = arith.constant 0 : i32
    %c0_i32_0 = arith.constant 0 : i32
    %c0_i32_1 = arith.constant 0 : i32
    return %c0_i32, %c0_i32_0 : i32, i32
  }
  func.func @transform_5(%arg0: i32, %arg1: i32) -> (i32, i32, i32, i32) {
    %c0_i32 = arith.constant 0 : i32
    %c0_i32_0 = arith.constant 0 : i32
    %c0_i32_1 = arith.constant 0 : i32
    return %arg0, %arg1, %c0_i32, %c0_i32_0 : i32, i32, i32, i32
  }
}

</mosaic_0001>

<bundles_post_ra>
// kernel: tpu_custom_call.1
= control target key start
LH: loop header
LB: loop body
LE: loop exit
PB: predicated region body
PF: predicated region fallthrough
CT: control target
= control target key end

     0   :  { %10 = vsyncpa [#allocation5], 0  ;;  %s3965_s0 = inlined_call_operand.vmem [shape: bf16[2,16,16,4], index: 0, kind: input, shape index: {}]   ;;  %s3966_s1 = inlined_call_operand.vmem [shape: bf16[2,16,16,4], index: 1, kind: input, shape index: {}]   ;;  %s3967_s2 = inlined_call_operand.vmem [shape: bf16[2,16,16,4], index: 2, kind: input, shape index: {}]   ;;  %s3968_s3 = inlined_call_operand.vmem [shape: bf16[128,128], index: 3, kind: input, shape index: {}]   ;;  %s3969_s4 = inlined_call_operand.vmem [shape: f32[1,128], index: 4, kind: input, shape index: {}]   ;;  %s3970_s5 = inlined_call_operand.hbm [shape: f32[2,16,16,128], index: 5, kind: output, shape index: {}]  }
   0x1   :  { %12 = vsyncpa [#allocation5 + $0x1], 0  ;;  %s3172_s18 = smov 0   ;;  %s3174_s19 = smov 0  }
   0x2   :  { %s3176_s20 = smov 0   ;;  %s3178_s21 = smov 0  }
   0x3   :  { %s3180_s22 = smov 0   ;;  %s3182_s23 = smov 0  }
   0x4   :  { %s3184_s24 = smov 0   ;;  %s3186_s25 = smov 0  }
   0x5 LB: > { %s2696_s26 = sadd.s32 4294967295, %s3127_s25   ;;  %s2697_s27 = sadd.s32 4294967294, %s3127_s25   ;;  %s3127_s25 = sphi %s3186_s25, %s18_s25   ;;  %s3123_s24 = sphi %s3184_s24, %s4000_s24   ;;  %s3119_s23 = sphi %s3182_s23, %s3999_s23   ;;  %s3115_s22 = sphi %s3180_s22, %s3998_s22   ;;  %s3111_s21 = sphi %s3178_s21, %s3997_s21   ;;  %s3107_s20 = sphi %s3176_s20, %s3996_s20   ;;  %s3103_s19 = sphi %s3174_s19, %s3995_s19   ;;  %s3099_s18 = sphi %s3172_s18, %s3994_s18  }
   0x6   : > { %s27_s28 = sadd.s32 1, %s3119_s23  ;;  %s30_s29 = sadd.s32 1, %s3123_s24 }
   0x7   : > { %p28_p0 = scmp.ge.s32.totalorder %s27_s28, 2  ;;  %p191_p1 = scmp.ne.s32.totalorder %s3107_s20, %s3103_s19 }
   0x8   : > { %p192_p2 = scmp.eq.s32.totalorder %s2696_s26, 3  ;;  %p197_p5 = scmp.ne.s32.totalorder %s3103_s19, %s3099_s18 }
   0x9   : > { %s4002_s28 = smov (%p28_p0, %s27_s28), 0  ;;  %s4004_s29 = smov (!%p28_p0, %s30_s29), %s3123_s24 }
   0xa   : > { %3974 = sst [smem:[#allocation7_spill]] %s4002_s28  ;;  %s177_s30 = ssub.s32 %s3119_s23, %s4002_s28 }
   0xb   : > { %p3223_p3 = por %p192_p2, %p191_p1  ;;  %p32_p4 = scmp.ge.s32.totalorder %s4004_s29, 2 }
   0xc   : > { %p198_p6 = scmp.eq.s32.totalorder %s2697_s27, 3  ;;  %p2706_p7 = scmp.ge.s32.totalorder %s3127_s25, 1 }
   0xd   : > { %s4006_s29 = smov (%p32_p4, %s4004_s29), 0  ;;  %p276_p9 = scmp.lt.s32.totalorder %s3127_s25, 5 }
   0xe   : > { %3976 = sst [smem:[#allocation8_spill]] %s4006_s29  ;;  %p3232_p8 = por %p198_p6, %p197_p5 }
   0xf   : > { %s176_s8 = ssub.s32 %s3123_s24, %s4006_s29  ;;  %s181_s9 = sadd.s32 1, %s3107_s20 }
  0x10   : > { %s178_s10 = sor.u32 %s177_s30, %s176_s8  ;;  %p277_p10 = pnand %p2706_p7, %p276_p9 }
  0x11   : > { %p179_p11 = scmp.eq.s32.totalorder %s178_s10, 0  ;;  %vm382_vm0 = vcmask (!%p277_p10), 24576   ;;  %vm383_vm1 = vsmask.f32 (!%p277_p10), 256  ;;  %v388_v0 = vld [vmem:[#allocation2 + $0xc] sm:$0x1] (!%p277_p10) }
  0x12   : > { %280 = sbr.rel (%p277_p10) target bundleno = 626 (0x272), region = 40  ;;  %s3971_s12 = sand.u32 (!%p277_p10), 1, %s3103_s19   ;;  %vm3246_vm2 = vmand (!%p277_p10), %vm382_vm0, %vm383_vm1  ;;  %v391_v2 = vld [vmem:[#allocation2 + $0x18] sm:$0x1] (!%p277_p10)  ;;  %v394_v3 = vld [vmem:[#allocation2 + $0x24] sm:$0x1] (!%p277_p10) }
  0x13   : > { %s3241_s11 = scalar_select %p179_p11, %s3107_s20, %s181_s9  }
  0x14   : > { %vm415_vm3 = vsmask.f32 (!%p277_p10), 7938  ;;  %v389_v4 = vsel (!%p277_p10), %vm3246_vm2, 0, %v388_v0  ;;  %v392_v5 = vsel (!%p277_p10), %vm3246_vm2, 0, %v391_v2  ;;  %v395_v6 = vsel (!%p277_p10), %vm3246_vm2, 0, %v394_v3  ;;  %s3258_s13 = sshll.u32 (!%p277_p10), %s3971_s12, 7 }
  0x15   : > { %v397_v7 = vld [vmem:[#allocation2 + $0x30] sm:$0x1] (!%p277_p10)  ;;  %390 = vst [vmem:[#allocation2 + $0xc] sm:$0x1] (!%p277_p10), %v389_v4  ;;  %393 = vst [vmem:[#allocation2 + $0x18] sm:$0x1] (!%p277_p10), %v392_v5 }
  0x16   : > { %396 = vst [vmem:[#allocation2 + $0x24] sm:$0x1] (!%p277_p10), %v395_v6  ;;  %v398_v8 = vsel (!%p277_p10), %vm3246_vm2, 0, %v397_v7  ;;  %v400_v9 = vld [vmem:[#allocation2 + $0x3c] sm:$0x1] (!%p277_p10)  ;;  %vm3264_vm4 = vmand (!%p277_p10), %vm382_vm0, %vm415_vm3  ;;  %s2708_s14 = sshll.u32 (!%p277_p10), %s3111_s21, 3 }
  0x17   : > { %v403_v10 = vld [vmem:[#allocation2 + $0x48] sm:$0x1] (!%p277_p10)  ;;  %399 = vst [vmem:[#allocation2 + $0x30] sm:$0x1] (!%p277_p10), %v398_v8  ;;  %v401_v12 = vsel (!%p277_p10), %vm3246_vm2, 0, %v400_v9  ;;  %p336_p12 = scmp.lt.s32.totalorder (!%p277_p10), %s3115_s22, 1 }
  0x18   : > { %v404_v13 = vsel (!%p277_p10), %vm3246_vm2, 0, %v403_v10  ;;  %v406_v14 = vld [vmem:[#allocation2 + $0x54] sm:$0x1] (!%p277_p10)  ;;  %v409_v15 = vld [vmem:[#allocation2 + $0x60] sm:$0x1] (!%p277_p10)  ;;  %p338_p13 = scmp.lt.s32.totalorder (!%p277_p10), %s2708_s14, 15 }
  0x19   : > { %402 = vst [vmem:[#allocation2 + $0x3c] sm:$0x1] %v401_v12  ;;  %405 = vst [vmem:[#allocation2 + $0x48] sm:$0x1] %v404_v13  ;;  %v407_v16 = vsel %vm3246_vm2, 0, %v406_v14  ;;  %v410_v17 = vsel %vm3246_vm2, 0, %v409_v15 }
  0x1a   : > { %v420_v18 = vld [vmem:[#allocation2 + $0x14] sm:$0x1]  ;;  %v423_v19 = vld [vmem:[#allocation2 + $0x20] sm:$0x1]  ;;  %408 = vst [vmem:[#allocation2 + $0x54] sm:$0x1] %v407_v16 }
  0x1b   : > { %411 = vst [vmem:[#allocation2 + $0x60] sm:$0x1] %v410_v17  ;;  %v421_v20 = vsel %vm3264_vm4, 0, %v420_v18  ;;  %v424_v21 = vsel %vm3264_vm4, 0, %v423_v19  ;;  %v426_v22 = vld [vmem:[#allocation2 + $0x2c] sm:$0x1] }
  0x1c   : > { %v429_v23 = vld [vmem:[#allocation2 + $0x38] sm:$0x1]  ;;  %422 = vst [vmem:[#allocation2 + $0x14] sm:$0x1] %v421_v20  ;;  %425 = vst [vmem:[#allocation2 + $0x20] sm:$0x1] %v424_v21 }
  0x1d   : > { %v427_v24 = vsel %vm3264_vm4, 0, %v426_v22  ;;  %v430_v25 = vsel %vm3264_vm4, 0, %v429_v23  ;;  %v432_v26 = vld [vmem:[#allocation2 + $0x44] sm:$0x1]  ;;  %v435_v27 = vld [vmem:[#allocation2 + $0x50] sm:$0x1] }
  0x1e   : > { %428 = vst [vmem:[#allocation2 + $0x2c] sm:$0x1] %v427_v24  ;;  %431 = vst [vmem:[#allocation2 + $0x38] sm:$0x1] %v430_v25  ;;  %v433_v28 = vsel %vm3264_vm4, 0, %v432_v26  ;;  %v436_v29 = vsel %vm3264_vm4, 0, %v435_v27 }
  0x1f   : > { %v438_v30 = vld [vmem:[#allocation2 + $0x5c] sm:$0x1]  ;;  %v441_v31 = vld [vmem:[#allocation2 + $0x68] sm:$0x1]  ;;  %434 = vst [vmem:[#allocation2 + $0x44] sm:$0x1] %v433_v28 }
  0x20   : > { %437 = vst [vmem:[#allocation2 + $0x50] sm:$0x1] %v436_v29  ;;  %v439_v32 = vsel %vm3264_vm4, 0, %v438_v30  ;;  %v442_v33 = vsel %vm3264_vm4, 0, %v441_v31  ;;  %v385_v34 = vld [vmem:[#allocation2] sm:$0x1] }
  0x21   : > { %v412_v35 = vld [vmem:[#allocation2 + $0x6c] sm:$0x1]  ;;  %440 = vst [vmem:[#allocation2 + $0x5c] sm:$0x1] %v439_v32  ;;  %443 = vst [vmem:[#allocation2 + $0x68] sm:$0x1] %v442_v33 }
  0x22   : > { %v386_v36 = vsel %vm3246_vm2, 0, %v385_v34  ;;  %v413_v37 = vsel %vm3246_vm2, 0, %v412_v35  ;;  %v417_v38 = vld [vmem:[#allocation2 + $0x8] sm:$0x1]  ;;  %v444_v39 = vld [vmem:[#allocation2 + $0x74] sm:$0x1] }
  0x23   : > { %387 = vst [vmem:[#allocation2] sm:$0x1] %v386_v36  ;;  %414 = vst [vmem:[#allocation2 + $0x6c] sm:$0x1] %v413_v37  ;;  %v418_v40 = vsel %vm3264_vm4, 0, %v417_v38  ;;  %v445_v41 = vsel %vm3264_vm4, 0, %v444_v39 }
  0x24   : > { %419 = vst [vmem:[#allocation2 + $0x8] sm:$0x1] %v418_v40  ;;  %446 = vst [vmem:[#allocation2 + $0x74] sm:$0x1] %v445_v41  ;;  %s2713_s15 = sadd.s32 4294967295, %s2708_s14  ;;  %s2852_s8 = sadd.s32 8, %s2708_s14 }
  0x25   : > { %s337_s16 = scalar_select %p336_p12, %s3115_s22, 1  ;;  %vm463_vm5 = vsmask.f32 4368  ;;  %vm626_vm6 = vcmask 27648   ;;  %v628_v48 = vld [vmem:[#allocation2 + $0xc] sm:$0xf] }
  0x26   : > { %s339_s17 = scalar_select %p338_p13, %s2708_s14, 15  ;;  %vm3326_vm7 = vmand %vm626_vm6, %vm415_vm3  ;;  %v633_v54 = vld [vmem:[#allocation2 + $0x14] sm:$0x1]  ;;  %v636_v2 = vld [vmem:[#allocation2 + $0x18] sm:$0xf] }
  0x27   : > { %s3303_s26 = sshll.u32 %s337_s16, 5  ;;  %p348_p0 = scmp.gt.s32.totalorder %s2713_s15, 0  ;;  %vm3332_vm8 = vmor %vm383_vm1, %vm463_vm5  ;;  %v640_v11 = vld [vmem:[#allocation2 + $0x20] sm:$0x1]  ;;  %v643_v27 = vld [vmem:[#allocation2 + $0x24] sm:$0xf] }
  0x28   : > { %s2709_s27 = sshll.u32 %s339_s17, 1  ;;  %p2714_p1 = scmp.lt.s32.totalorder %s2713_s15, 15  ;;  %v647_v28 = vld [vmem:[#allocation2 + $0x2c] sm:$0x1] }
  0x29   : > { %s342_s30 = sadd.s32 %s3303_s26, %s2709_s27  ;;  %p3306_p2 = scmp.lt.s32.totalorder %s2852_s8, 15 }
  0x2a   : > { %s2711_s9 = sshll.u32 %s342_s30, 2  ;;  %p2729_p4 = scmp.le.s32.totalorder %s3111_s21, 0 }
  0x2b   : > { %s3313_s28 = scalar_lea.vmem %s3965_s0, %s2711_s9  ;;  %s4008_s8 = smov (!%p3306_p2, %s2852_s8), 15 }
  0x2c   : > { %s349_s16 = scalar_select %p348_p0, %s2713_s15, 0  ;;  %v447_v42 = vld [vmem:[%s3313_s28] sm:$0xf]  ;;  %v448_v43 = vld [vmem:[%s3313_s28 + $0x4] sm:$0xf] }
  0x2d   : > { %v466_v44 = vshrl.u32 %v447_v42, 16  ;;  %v469_v45 = vshll.u32 %v447_v42, 16  ;;  %v474_v46 = vshrl.u32 %v448_v43, 16  ;;  %v477_v47 = vshll.u32 %v448_v43, 16  ;;  %v449_v49 = vld [vmem:[%s3313_s28 + $0x8] sm:$0xf] }
  0x2e   : > { %s4010_s16 = smov (!%p2714_p1, %s349_s16), 15  ;;  %v450_v50 = vld [vmem:[%s3313_s28 + $0xc] sm:$0xf]  ;;  %s4012_s8 = smov (!%p3306_p2, %s4008_s8), 15  ;;  %v483_v55 = vshrl.u32 %v449_v49, 16  ;;  %v486_v57 = vshll.u32 %v449_v49, 16 }
  0x2f   : > { %v468_v51 = vrot.slane %v466_v44, 7  ;;  %v476_v53 = vrot.slane %v474_v46, 7  ;;  %s2719_s29 = sshll.u32 %s4010_s16, 1  ;;  %v491_v58 = vshrl.u32 %v450_v50, 16  ;;  %v494_v59 = vshll.u32 %v450_v50, 16  ;;  %s2726_s14 = sshll.u32 %s4012_s8, 1 }
  0x30   : > { %v451_v60 = vld [vmem:[%s3313_s28 + $0x10] sm:$0xf]  ;;  %s356_s12 = sadd.s32 %s2719_s29, %s3303_s26  ;;  %v452_v3 = vld [vmem:[%s3313_s28 + $0x14] sm:$0xf]  ;;  %s373_s17 = sadd.s32 %s2726_s14, %s3303_s26  ;;  %v485_v4 = vrot.slane %v483_v55, 7 }
  0x31   : > { %v471_v61 = vor.u32 %v469_v45, %v468_v51  ;;  %v472_v62 = vrot.slane %v468_v51, 4  ;;  %v479_v63 = vor.u32 %v477_v47, %v476_v53  ;;  %v481_v0 = vrot.slane %v476_v53, 4  ;;  %s2721_s15 = sshll.u32 %s356_s12, 2  ;;  %s2728_s8 = sshll.u32 %s373_s17, 2  ;;  %v453_v13 = vld [vmem:[%s3313_s28 + $0x18] sm:$0xf] }
  0x32   : > { %v493_v5 = vrot.slane %v491_v58, 7  ;;  %v500_v6 = vshrl.u32 %v451_v60, 16  ;;  %v503_v7 = vshll.u32 %v451_v60, 16  ;;  %s3343_s9 = scalar_lea.vmem %s3966_s1, %s2721_s15  ;;  %v508_v12 = vshrl.u32 %v452_v3, 16  ;;  %s3355_s16 = scalar_lea.vmem %s3967_s2, %s2728_s8  ;;  %v454_v18 = vld [vmem:[%s3313_s28 + $0x1c] sm:$0xf] }
  0x33   : > { %v629_v8 = vsel %vm3326_vm7, %v471_v61, %v628_v48  ;;  %v480_v9 = vsel %vm3332_vm8, %v472_v62, %v479_v63  ;;  %v634_v10 = vsel %vm3246_vm2, %v481_v0, %v633_v54  ;;  %v488_v14 = vor.u32 %v486_v57, %v485_v4  ;;  %v455_v23 = vld [vmem:[%s3313_s28 + $0x20] sm:$0xf]  ;;  %v456_v34 = vld [vmem:[%s3313_s28 + $0x24] sm:$0xf]  ;;  %v457_v39 = vld [vmem:[%s3313_s28 + $0x28] sm:$0xf] }
  0x34   : > { %630 = vst [vmem:[#allocation2 + $0xc] sm:$0xf] %v629_v8  ;;  %632 = vst.msk [vmem:[#allocation2 + $0x10] sm:$0xf] %vm626_vm6, %v480_v9  ;;  %v489_v15 = vrot.slane %v485_v4, 4  ;;  %v496_v16 = vor.u32 %v494_v59, %v493_v5  ;;  %v498_v17 = vrot.slane %v493_v5, 4 }
  0x35   : > { %635 = vst [vmem:[#allocation2 + $0x14] sm:$0x1] %v634_v10  ;;  %v502_v19 = vrot.slane %v500_v6, 7  ;;  %v510_v20 = vrot.slane %v508_v12, 7  ;;  %v511_v21 = vshll.u32 %v452_v3, 16  ;;  %v517_v22 = vshrl.u32 %v453_v13, 16 }
  0x36   : > { %v637_v24 = vsel %vm3326_vm7, %v488_v14, %v636_v2  ;;  %v497_v25 = vsel %vm3332_vm8, %v489_v15, %v496_v16  ;;  %v641_v26 = vsel %vm3246_vm2, %v498_v17, %v640_v11  ;;  %v520_v29 = vshll.u32 %v453_v13, 16  ;;  %v650_v43 = vld [vmem:[#allocation2 + $0x30] sm:$0xf]  ;;  %v654_v44 = vld [vmem:[#allocation2 + $0x38] sm:$0x1] }
  0x37   : > { %638 = vst [vmem:[#allocation2 + $0x18] sm:$0xf] %v637_v24  ;;  %639 = vst.msk [vmem:[#allocation2 + $0x1c] sm:$0xf] %vm626_vm6, %v497_v25  ;;  %v505_v30 = vor.u32 %v503_v7, %v502_v19  ;;  %v506_v31 = vrot.slane %v502_v19, 4  ;;  %v513_v32 = vor.u32 %v511_v21, %v510_v20  ;;  %v515_v33 = vrot.slane %v510_v20, 4 }
  0x38   : > { %642 = vst [vmem:[#allocation2 + $0x20] sm:$0x1] %v641_v26  ;;  %v519_v35 = vrot.slane %v517_v22, 7  ;;  %v525_v36 = vshrl.u32 %v454_v18, 16  ;;  %v528_v37 = vshll.u32 %v454_v18, 16  ;;  %v534_v38 = vshrl.u32 %v455_v23, 16 }
  0x39   : > { %v644_v40 = vsel %vm3326_vm7, %v505_v30, %v643_v27  ;;  %v514_v41 = vsel %vm3332_vm8, %v506_v31, %v513_v32  ;;  %v648_v42 = vsel %vm3246_vm2, %v515_v33, %v647_v28  ;;  %v537_v45 = vshll.u32 %v455_v23, 16  ;;  %v458_v50 = vld [vmem:[%s3313_s28 + $0x2c] sm:$0xf]  ;;  %v657_v51 = vld [vmem:[#allocation2 + $0x3c] sm:$0xf] }
  0x3a   : > { %645 = vst [vmem:[#allocation2 + $0x24] sm:$0xf] %v644_v40  ;;  %646 = vst.msk [vmem:[#allocation2 + $0x28] sm:$0xf] %vm626_vm6, %v514_v41  ;;  %v522_v46 = vor.u32 %v520_v29, %v519_v35  ;;  %v523_v47 = vrot.slane %v519_v35, 4  ;;  %v527_v48 = vrot.slane %v525_v36, 7 }
  0x3b   : > { %649 = vst [vmem:[#allocation2 + $0x2c] sm:$0x1] %v648_v42  ;;  %v536_v49 = vrot.slane %v534_v38, 7  ;;  %v542_v53 = vshrl.u32 %v456_v34, 16  ;;  %v545_v54 = vshll.u32 %v456_v34, 16  ;;  %v551_v55 = vshrl.u32 %v457_v39, 16 }
  0x3c   : > { %v554_v57 = vshll.u32 %v457_v39, 16  ;;  %v651_v58 = vsel %vm3326_vm7, %v522_v46, %v650_v43  ;;  %v530_v59 = vor.u32 %v528_v37, %v527_v48  ;;  %v532_v60 = vrot.slane %v527_v48, 4  ;;  %v459_v62 = vld [vmem:[%s3313_s28 + $0x30] sm:$0xf]  ;;  %v460_v4 = vld [vmem:[%s3313_s28 + $0x34] sm:$0xf] }
  0x3d   : > { %v539_v61 = vor.u32 %v537_v45, %v536_v49  ;;  %652 = vst [vmem:[#allocation2 + $0x30] sm:$0xf] %v651_v58  ;;  %v540_v63 = vrot.slane %v536_v49, 4  ;;  %v544_v0 = vrot.slane %v542_v53, 7  ;;  %v553_v2 = vrot.slane %v551_v55, 7 }
  0x3e   : > { %v559_v3 = vshrl.u32 %v458_v50, 16  ;;  %v531_v5 = vsel %vm3332_vm8, %v523_v47, %v530_v59  ;;  %v655_v6 = vsel %vm3246_vm2, %v532_v60, %v654_v44  ;;  %v661_v8 = vld [vmem:[#allocation2 + $0x44] sm:$0x1]  ;;  %v664_v9 = vld [vmem:[#allocation2 + $0x48] sm:$0xf]  ;;  %v562_v10 = vshll.u32 %v458_v50, 16 }
  0x3f   : > { %v658_v7 = vsel %vm3326_vm7, %v539_v61, %v657_v51  ;;  %653 = vst.msk [vmem:[#allocation2 + $0x34] sm:$0xf] %vm626_vm6, %v531_v5  ;;  %656 = vst [vmem:[#allocation2 + $0x38] sm:$0x1] %v655_v6  ;;  %v547_v11 = vor.u32 %v545_v54, %v544_v0  ;;  %v549_v12 = vrot.slane %v544_v0, 4  ;;  %v556_v13 = vor.u32 %v554_v57, %v553_v2 }
  0x40   : > { %659 = vst [vmem:[#allocation2 + $0x3c] sm:$0xf] %v658_v7  ;;  %v557_v14 = vrot.slane %v553_v2, 4  ;;  %v461_v15 = vld [vmem:[%s3313_s28 + $0x38] sm:$0xf]  ;;  %v561_v16 = vrot.slane %v559_v3, 7 }
  0x41   : > { %v568_v17 = vshrl.u32 %v459_v62, 16  ;;  %v571_v18 = vshll.u32 %v459_v62, 16  ;;  %v576_v19 = vshrl.u32 %v460_v4, 16  ;;  %v462_v20 = vld [vmem:[%s3313_s28 + $0x3c] sm:$0xf]  ;;  %v548_v21 = vsel %vm3332_vm8, %v540_v63, %v547_v11  ;;  %s3417_s28 = scalar_lea.vmem [#allocation4], %s3258_s13 }
  0x42   : > { %v662_v22 = vsel %vm3246_vm2, %v549_v12, %v661_v8  ;;  %v665_v23 = vsel %vm3326_vm7, %v556_v13, %v664_v9  ;;  %v668_v24 = vld [vmem:[#allocation2 + $0x50] sm:$0x1]  ;;  %v579_v25 = vshll.u32 %v460_v4, 16  ;;  %660 = vst.msk [vmem:[#allocation2 + $0x40] sm:$0xf] %vm626_vm6, %v548_v21  ;;  %v564_v26 = vor.u32 %v562_v10, %v561_v16 }
  0x43   : > { %663 = vst [vmem:[#allocation2 + $0x44] sm:$0x1] %v662_v22  ;;  %666 = vst [vmem:[#allocation2 + $0x48] sm:$0xf] %v665_v23  ;;  %v566_v27 = vrot.slane %v561_v16, 4  ;;  %v570_v28 = vrot.slane %v568_v17, 7 }
  0x44   : > { %v578_v29 = vrot.slane %v576_v19, 7  ;;  %v671_v30 = vld [vmem:[#allocation2 + $0x54] sm:$0xf]  ;;  %v585_v31 = vshrl.u32 %v461_v15, 16  ;;  %v588_v32 = vshll.u32 %v461_v15, 16  ;;  %v593_v33 = vshrl.u32 %v462_v20, 16 }
  0x45   : > { %v596_v34 = vshll.u32 %v462_v20, 16  ;;  %v565_v35 = vsel %vm3332_vm8, %v557_v14, %v564_v26  ;;  %v669_v36 = vsel %vm3246_vm2, %v566_v27, %v668_v24  ;;  %v573_v37 = vor.u32 %v571_v18, %v570_v28  ;;  %v675_v39 = vld [vmem:[#allocation2 + $0x5c] sm:$0x1]  ;;  %v678_v45 = vld [vmem:[#allocation2 + $0x60] sm:$0xf] }
  0x46   : > { %v574_v38 = vrot.slane %v570_v28, 4  ;;  %667 = vst.msk [vmem:[#allocation2 + $0x4c] sm:$0xf] %vm626_vm6, %v565_v35  ;;  %670 = vst [vmem:[#allocation2 + $0x50] sm:$0x1] %v669_v36  ;;  %v581_v40 = vor.u32 %v579_v25, %v578_v29  ;;  %v583_v41 = vrot.slane %v578_v29, 4 }
  0x47   : > { %v587_v42 = vrot.slane %v585_v31, 7  ;;  %v595_v43 = vrot.slane %v593_v33, 7  ;;  %v672_v44 = vsel %vm3326_vm7, %v573_v37, %v671_v30  ;;  %v682_v50 = vld [vmem:[#allocation2 + $0x68] sm:$0x1]  ;;  %688 = sbr.rel (%p2729_p4) target bundleno = 83 (0x53), region = 44 }
  0x48   : > { %673 = vst [vmem:[#allocation2 + $0x54] sm:$0xf] %v672_v44  ;;  %v582_v46 = vsel %vm3332_vm8, %v574_v38, %v581_v40  ;;  %v676_v47 = vsel %vm3246_vm2, %v583_v41, %v675_v39  ;;  %v689_v58 = vld [vmem:[%s3343_s9] sm:$0xf] (!%p2729_p4)  ;;  %v690_v59 = vld [vmem:[%s3343_s9 + $0x4] sm:$0xf] (!%p2729_p4) }
  0x49   : > { %v590_v48 = vor.u32 %v588_v32, %v587_v42  ;;  %v591_v49 = vrot.slane %v587_v42, 4  ;;  %674 = vst.msk [vmem:[#allocation2 + $0x58] sm:$0xf] %vm626_vm6, %v582_v46  ;;  %677 = vst [vmem:[#allocation2 + $0x5c] sm:$0x1] %v676_v47  ;;  %v598_v51 = vor.u32 %v596_v34, %v595_v43  ;;  %v600_v53 = vrot.slane %v595_v43, 4 }
  0x4a   : > { %v692_v60 = vshrl.u32 (!%p2729_p4), %v689_v58, 16  ;;  %v695_v61 = vshll.u32 (!%p2729_p4), %v689_v58, 16  ;;  %v700_v62 = vshrl.u32 (!%p2729_p4), %v690_v59, 16  ;;  %v703_v63 = vshll.u32 (!%p2729_p4), %v690_v59, 16  ;;  %v711_v3 = vld [vmem:[#allocation2] sm:$0xf] (!%p2729_p4) }
  0x4b   : > { %v679_v54 = vsel %vm3326_vm7, %v590_v48, %v678_v45  ;;  %v599_v55 = vsel %vm3332_vm8, %v591_v49, %v598_v51  ;;  %v683_v57 = vsel %vm3246_vm2, %v600_v53, %v682_v50  ;;  %v715_v4 = vld [vmem:[#allocation2 + $0x8] sm:$0x1] (!%p2729_p4) }
  0x4c   : > { %680 = vst [vmem:[#allocation2 + $0x60] sm:$0xf] %v679_v54  ;;  %681 = vst.msk [vmem:[#allocation2 + $0x64] sm:$0xf] %vm626_vm6, %v599_v55  ;;  %v694_v0 = vrot.slane (!%p2729_p4), %v692_v60, 7  ;;  %v702_v2 = vrot.slane (!%p2729_p4), %v700_v62, 7 }
  0x4d   : > { %684 = vst [vmem:[#allocation2 + $0x68] sm:$0x1] %v683_v57 }
  0x4e   : > { %v697_v5 = vor.u32 %v695_v61, %v694_v0  ;;  %v698_v6 = vrot.slane %v694_v0, 4  ;;  %v705_v7 = vor.u32 %v703_v63, %v702_v2  ;;  %v707_v8 = vrot.slane %v702_v2, 4 }
  0x50   : > { %v712_v9 = vsel %vm3326_vm7, %v697_v5, %v711_v3  ;;  %v706_v10 = vsel %vm3332_vm8, %v698_v6, %v705_v7  ;;  %v716_v11 = vsel %vm3246_vm2, %v707_v8, %v715_v4 }
  0x51   : > { %713 = vst [vmem:[#allocation2] sm:$0xf] %v712_v9  ;;  %714 = vst.msk [vmem:[#allocation2 + $0x4] sm:$0xf] %vm626_vm6, %v706_v10 }
  0x52   : > { %717 = vst [vmem:[#allocation2 + $0x8] sm:$0x1] %v716_v11 }
  0x53 PF: > { %p2730_p5 = scmp.ne.s32.totalorder %s3111_s21, 0 }
  0x54   : > { %v3129_v15 = vmov (!%p2730_p5), 0  }
  0x55   : > { %721 = sbr.rel (%p2730_p5) target bundleno = 92 (0x5c), region = 48  ;;  %725 = vst.msk [vmem:[#allocation2 + $0x4] sm:$0xf] (!%p2730_p5), %vm626_vm6, %v3129_v15 }
  0x58   : > { %v722_v12 = vld [vmem:[#allocation2] sm:$0xf] (!%p2730_p5) }
  0x59   : > { %v726_v13 = vld [vmem:[#allocation2 + $0x8] sm:$0x1] (!%p2730_p5)  ;;  %v723_v14 = vsel (!%p2730_p5), %vm3326_vm7, 0, %v722_v12 }
  0x5a   : > { %v727_v16 = vsel (!%p2730_p5), %vm3246_vm2, 0, %v726_v13  ;;  %724 = vst [vmem:[#allocation2] sm:$0xf] (!%p2730_p5), %v723_v14 }
  0x5b   : > { %728 = vst [vmem:[#allocation2 + $0x8] sm:$0x1] (!%p2730_p5), %v727_v16 }
  0x5c PF: > { %p2731_p6 = scmp.ge.s32.totalorder %s3111_s21, 1 }
  0x5d   : > { %v733_v17 = vld [vmem:[%s3355_s16] sm:$0xf] (!%p2731_p6)  ;;  %v734_v18 = vld [vmem:[%s3355_s16 + $0x4] sm:$0xf] (!%p2731_p6)  ;;  %v756_v25 = vld [vmem:[#allocation2 + $0x6c] sm:$0xf] (!%p2731_p6) }
  0x5e   : > { %732 = sbr.rel (%p2731_p6) target bundleno = 103 (0x67), region = 52  ;;  %v736_v19 = vshrl.u32 (!%p2731_p6), %v733_v17, 16  ;;  %v739_v20 = vshll.u32 (!%p2731_p6), %v733_v17, 16  ;;  %v744_v21 = vshrl.u32 (!%p2731_p6), %v734_v18, 16  ;;  %v747_v22 = vshll.u32 (!%p2731_p6), %v734_v18, 16 }
  0x5f   : > { %v760_v26 = vld [vmem:[#allocation2 + $0x74] sm:$0x1] (!%p2731_p6) }
  0x60   : > { %v738_v23 = vrot.slane (!%p2731_p6), %v736_v19, 7  ;;  %v746_v24 = vrot.slane (!%p2731_p6), %v744_v21, 7 }
  0x62   : > { %v741_v27 = vor.u32 (!%p2731_p6), %v739_v20, %v738_v23  ;;  %v742_v28 = vrot.slane (!%p2731_p6), %v738_v23, 4  ;;  %v749_v29 = vor.u32 (!%p2731_p6), %v747_v22, %v746_v24  ;;  %v751_v30 = vrot.slane (!%p2731_p6), %v746_v24, 4 }
  0x64   : > { %v757_v31 = vsel (!%p2731_p6), %vm3326_vm7, %v741_v27, %v756_v25  ;;  %v750_v32 = vsel (!%p2731_p6), %vm3332_vm8, %v742_v28, %v749_v29  ;;  %v761_v33 = vsel (!%p2731_p6), %vm3246_vm2, %v751_v30, %v760_v26 }
  0x65   : > { %758 = vst [vmem:[#allocation2 + $0x6c] sm:$0xf] %v757_v31  ;;  %759 = vst.msk [vmem:[#allocation2 + $0x70] sm:$0xf] %vm626_vm6, %v750_v32 }
  0x66   : > { %762 = vst [vmem:[#allocation2 + $0x74] sm:$0x1] %v761_v33 }
  0x67 PF: > { %p2732_p7 = scmp.ne.s32.totalorder %s3111_s21, 1 }
  0x68   : > { %v3130_v37 = vmov (!%p2732_p7), 0  }
  0x69   : > { %766 = sbr.rel (%p2732_p7) target bundleno = 113 (0x71), region = 56  ;;  %771 = vst.msk [vmem:[#allocation2 + $0x70] sm:$0xf] (!%p2732_p7), %vm626_vm6, %v3130_v37 }
  0x6d   : > { %v772_v35 = vld [vmem:[#allocation2 + $0x74] sm:$0x1] (!%p2732_p7) }
  0x6e   : > { %v768_v34 = vld [vmem:[#allocation2 + $0x6c] sm:$0xf] (!%p2732_p7)  ;;  %v773_v56 = vsel (!%p2732_p7), %vm3246_vm2, 0, %v772_v35 }
  0x6f   : > { %v769_v36 = vsel (!%p2732_p7), %vm3326_vm7, 0, %v768_v34  ;;  %774 = vst [vmem:[#allocation2 + $0x74] sm:$0x1] (!%p2732_p7), %v773_v56 }
  0x70   : > { %770 = vst [vmem:[#allocation2 + $0x6c] sm:$0xf] %v769_v36 }
  0x71 PF: > { %v1136_v38 = vld [vmem:[#allocation2 + $0x30] sm:$0xe]  ;;  %v1137_v39 = vld [vmem:[#allocation2 + $0x34] sm:$0xf]  ;;  %v1138_v40 = vld [vmem:[#allocation2 + $0x38] sm:$0x1] }
  0x72   : > { %vm1172_vm9 = vcmask 1042432   ;;  %vm1173_vm10 = vcmask 1046532   ;;  %v2753_v41 = vrot.slane %v1136_v38, 9  ;;  %v1205_v42 = vrot.slane %v1137_v39, 5  ;;  %v1124_v44 = vld [vmem:[#allocation2] sm:$0xe] }
  0x73   : > { %vm3451_vm11 = vmor %vm1172_vm9, %vm1173_vm10  ;;  %v1208_v52 = vrot.slane %v1138_v40, 5  ;;  %v1125_v45 = vld [vmem:[#allocation2 + $0x4] sm:$0xf]  ;;  %v1126_v47 = vld [vmem:[#allocation2 + $0x8] sm:$0x1]  ;;  %v2749_v48 = vrot.slane %v1124_v44, 9 }
  0x74   : > { %v1206_v1 = vsel %vm3451_vm11, %v2753_v41, %v1205_v42  ;;  %v1207_v46 = vrot.slane %v1205_v42, 4  ;;  %v1177_v49 = vrot.slane %v1125_v45, 5  ;;  %v1180_v50 = vrot.slane %v1126_v47, 5  ;;  %v1139_v51 = vld [vmem:[#allocation2 + $0x3c] sm:$0xe]  ;;  %s3131_s13 = smov 8  }
  0x75   : > { %v1140_v53 = vld [vmem:[#allocation2 + $0x40] sm:$0xf]  ;;  %v1141_v58 = vld [vmem:[#allocation2 + $0x44] sm:$0x1]  ;;  %v2754_v59 = vrot.slane %v1139_v51, 9  ;;  %s3132_s29 = smov 4  }
  0x76   : > { %v1209_v54 = vsel %vm3451_vm11, %v1207_v46, %v1208_v52  ;;  %v1178_v55 = vsel %vm3451_vm11, %v2749_v48, %v1177_v49  ;;  %v1179_v57 = vrot.slane %v1177_v49, 4  ;;  %v1127_v60 = vld [vmem:[#allocation2 + $0xc] sm:$0xe]  ;;  %v1212_v62 = vrot.slane %v1140_v53, 5  ;;  %v1128_v0 = vld [vmem:[#allocation2 + $0x10] sm:$0xf] }
  0x77   : > { %v2761_v61 = vcombine.low %v1206_v1, %v1209_v54  ;;  %v1215_v63 = vrot.slane %v1141_v58, 5  ;;  %v1129_v2 = vld [vmem:[#allocation2 + $0x14] sm:$0x1]  ;;  %v2750_v4 = vrot.slane %v1127_v60, 9  ;;  %v1184_v5 = vrot.slane %v1128_v0, 5  ;;  %s3133_s12 = smov 12  }
  0x78   : > { %v1181_v3 = vsel %vm3451_vm11, %v1179_v57, %v1180_v50  ;;  %v1187_v6 = vrot.slane %v1129_v2, 5  ;;  %v851_v7 = vld [vmem:[#allocation2 + $0xc] sm:$0xf]  ;;  %v1213_v9 = vsel %vm3451_vm11, %v2754_v59, %v1212_v62  ;;  %v1214_v10 = vrot.slane %v1212_v62, 4  ;;  %v852_v11 = vld [vmem:[#allocation2 + $0x10] sm:$0xf] }
  0x79   : > { %1263 = vrot.lane.b32.xlu1 %v2761_v61, %s3131_s13  ;;  %v2757_v8 = vcombine.low %v1178_v55, %v1181_v3  ;;  %v853_v12 = vld [vmem:[#allocation2 + $0x14] sm:$0x1]  ;;  %v900_v13 = vshrl.u32 %v851_v7, 16  ;;  %v1185_v14 = vsel %vm3451_vm11, %v2750_v4, %v1184_v5  ;;  %v1186_v15 = vrot.slane %v1184_v5, 4  ;;  %v848_v20 = vld [vmem:[#allocation2] sm:$0xf] }
  0x7a   : > { %vm872_vm12 = vsmask.f32 3328  ;;  %vm873_vm13 = vsmask.f32 7440  ;;  %v1216_v16 = vsel %vm3451_vm11, %v1214_v10, %v1215_v63  ;;  %v903_v18 = vshll.u32 %v851_v7, 16  ;;  %s3134_s14 = smov 16  }
  0x7b   : > { %1255 = vrot.lane.b32.xlu0 %v2757_v8, %s3131_s13  ;;  %v902_v17 = vrot.slane %v900_v13, 4  ;;  %v909_v19 = vshll.u32 %v852_v11, 16  ;;  %v2762_v21 = vcombine.low %v1213_v9, %v1216_v16  ;;  %v1188_v22 = vsel %vm3451_vm11, %v1186_v15, %v1187_v6  ;;  %v849_v25 = vld [vmem:[#allocation2 + $0x4] sm:$0xf]  ;;  %v850_v26 = vld [vmem:[#allocation2 + $0x8] sm:$0x1]  ;;  %vm3477_vm14 = vmor %vm872_vm12, %vm873_vm13 }
  0x7c   : > { %v913_v23 = vshrl.u32 %v852_v11, 16  ;;  %v919_v24 = vshll.u32 %v853_v12, 16  ;;  %v2758_v27 = vcombine.low %v1185_v14, %v1188_v22  ;;  %v905_v28 = vrot.slane %v903_v18, 5  ;;  %v863_v31 = vld [vmem:[#allocation2 + $0x3c] sm:$0xf]  ;;  %s3135_s15 = smov 20  }
  0x7d   : > { %v911_v29 = vrot.slane %v909_v19, 5  ;;  %v876_v30 = vshrl.u32 %v848_v20, 16  ;;  %1265 = vrot.lane.b32.xlu1 %v2762_v21, %s3131_s13  ;;  %v879_v34 = vshll.u32 %v848_v20, 16  ;;  %v885_v35 = vshll.u32 %v849_v25, 16  ;;  %v864_v39 = vld [vmem:[#allocation2 + $0x40] sm:$0xf] }
  0x7e   : > { %v915_v32 = vrot.slane %v913_v23, 4  ;;  %v921_v33 = vrot.slane %v919_v24, 5  ;;  %v906_v36 = vor.u32 %v905_v28, %v902_v17  ;;  %v889_v56 = vshrl.u32 %v849_v25, 16  ;;  %v865_v44 = vld [vmem:[#allocation2 + $0x44] sm:$0x1]  ;;  %s3136_s17 = smov 24  }
  0x7f   : > { %1257 = vrot.lane.b32.xlu0 %v2758_v27, %s3131_s13  ;;  %v878_v37 = vrot.slane %v876_v30, 4  ;;  %v895_v38 = vshll.u32 %v850_v26, 16  ;;  %v881_v42 = vrot.slane %v879_v34, 5  ;;  %v887_v52 = vrot.slane %v885_v35, 5  ;;  %v860_v49 = vld [vmem:[#allocation2 + $0x30] sm:$0xf] }
  0x80   : > { %v916_v41 = vor.u32 %v915_v32, %v911_v29  ;;  %v996_v45 = vshrl.u32 %v863_v31, 16  ;;  %v907_v1 = vrot.slane %v906_v36, 4  ;;  %v891_v46 = vrot.slane %v889_v56, 4  ;;  %v861_v55 = vld [vmem:[#allocation2 + $0x34] sm:$0xf]  ;;  %s3137_s27 = smov 28  }
  0x81   : > { %v897_v47 = vrot.slane %v895_v38, 5  ;;  %v999_v48 = vshll.u32 %v863_v31, 16  ;;  %v882_v51 = vor.u32 %v881_v42, %v878_v37  ;;  %v1005_v54 = vshll.u32 %v864_v39, 16  ;;  %v862_v2 = vld [vmem:[#allocation2 + $0x38] sm:$0x1]  ;;  %s3138_s30 = smov 32  }
  0x82   : > { %v917_v50 = vrot.slane %v916_v41, 4  ;;  %v998_v53 = vrot.slane %v996_v45, 4  ;;  %v912_v57 = vsel %vm3477_vm14, %v907_v1, %v911_v29  ;;  %v892_v58 = vor.u32 %v891_v46, %v887_v52  ;;  %v1389_v19 = vld [vmem:[#allocation2 + $0x3c] sm:$0xf]  ;;  %v1390_v24 = vld [vmem:[#allocation2 + $0x40] sm:$0xf] }
  0x83   : > { %v1001_v59 = vrot.slane %v999_v48, 5  ;;  %v1009_v60 = vshrl.u32 %v864_v39, 16  ;;  %v883_v62 = vrot.slane %v882_v51, 4  ;;  %v1007_v63 = vrot.slane %v1005_v54, 5  ;;  %v1391_v27 = vld [vmem:[#allocation2 + $0x44] sm:$0x1] }
  0x84   : > { %v922_v61 = vsel %vm3477_vm14, %v917_v50, %v921_v33  ;;  %v1015_v0 = vshll.u32 %v865_v44, 16  ;;  %v893_v4 = vrot.slane %v892_v58, 4  ;;  %v972_v9 = vshrl.u32 %v860_v49, 16  ;;  %v1377_v34 = vld [vmem:[#allocation2 + $0xc] sm:$0xf]  ;;  %v3001_v1 = vld [vmem:[#allocation2 + $0x3c] sm:$0xff]  }
  0x85   : > { %v2742_v3 = vcombine.low %v912_v57, %v922_v61  ;;  %v1002_v5 = vor.u32 %v1001_v59, %v998_v53  ;;  %v1011_v6 = vrot.slane %v1009_v60, 4  ;;  %v888_v7 = vsel %vm3477_vm14, %v883_v62, %v887_v52  ;;  %v1378_v38 = vld [vmem:[#allocation2 + $0x10] sm:$0xf]  ;;  %v1379_v51 = vld [vmem:[#allocation2 + $0x14] sm:$0x1]  ;;  %s2841_s9 = sshll.u32 %s3115_s22, 5 }
  0x86   : > { %v1017_v8 = vrot.slane %v1015_v0, 5  ;;  %v975_v10 = vshll.u32 %v860_v49, 16  ;;  %v898_v11 = vsel %vm3477_vm14, %v893_v4, %v897_v47  ;;  %v981_v14 = vshll.u32 %v861_v55, 16  ;;  %v1392_v54 = vld [vmem:[#allocation2 + $0x48] sm:$0xf]  ;;  %s2569_s22 = sshll.u32 %s3417_s28, 4  ;;  %s3906_s22 = int_to_ptr.vmem [resolvable:$true] %s2569_s22 }
  0x87   : > { %1093 = vrot.lane.b32.xlu1 %v2742_v3, %s3132_s29  ;;  %v1003_v12 = vrot.slane %v1002_v5, 4  ;;  %v1012_v13 = vor.u32 %v1011_v6, %v1007_v63  ;;  %v2741_v15 = vcombine.low %v888_v7, %v898_v11  ;;  %v974_v16 = vrot.slane %v972_v9, 4  ;;  %v1393_v60 = vld [vmem:[#allocation2 + $0x4c] sm:$0xf]  ;;  %s3991_s16 = sand.u32 1, %s3103_s19  }
  0x88   : > { %v977_v17 = vrot.slane %v975_v10, 5  ;;  %v985_v18 = vshrl.u32 %v861_v55, 16  ;;  %v983_v22 = vrot.slane %v981_v14, 5  ;;  %v991_v23 = vshll.u32 %v862_v2, 16  ;;  %v3002_v2 = vld [vmem:[#allocation2 + $0xc] sm:$0xff]  }
  0x89   : > { %v1008_v20 = vsel %vm3477_vm14, %v1003_v12, %v1007_v63  ;;  %v1013_v21 = vrot.slane %v1012_v13, 4  ;;  %1091 = vrot.lane.b32.xlu0 %v2741_v15, %s3132_s29  ;;  %v1498_v28 = vshrl.u32 %v1389_v19, 16  ;;  %v1501_v29 = vshll.u32 %v1389_v19, 16  ;;  %v3003_v3 = vld [vmem:[#allocation2 + $0x48] sm:$0xff]   ;;  %v1394_v10 = vld [vmem:[#allocation2 + $0x50] sm:$0x1] }
  0x8a   : > { %v978_v25 = vor.u32 %v977_v17, %v974_v16  ;;  %v987_v26 = vrot.slane %v985_v18, 4  ;;  %v993_v31 = vrot.slane %v991_v23, 5  ;;  %v1507_v32 = vshll.u32 %v1390_v24, 16  ;;  %v1380_v13 = vld [vmem:[#allocation2 + $0x18] sm:$0xf] }
  0x8b   : > { %v1018_v30 = vsel %vm3477_vm14, %v1013_v21, %v1017_v8  ;;  %v1511_v33 = vshrl.u32 %v1390_v24, 16  ;;  %v1500_v56 = vrot.slane %v1498_v28, 4  ;;  %v1503_v39 = vrot.slane %v1501_v29, 5  ;;  %v1381_v18 = vld [vmem:[#allocation2 + $0x1c] sm:$0xf] }
  0x8c   : > { %v2746_v35 = vcombine.low %v1008_v20, %v1018_v30  ;;  %v979_v36 = vrot.slane %v978_v25, 4  ;;  %v988_v37 = vor.u32 %v987_v26, %v983_v22  ;;  %v1509_v41 = vrot.slane %v1507_v32, 5  ;;  %v1382_v23 = vld [vmem:[#allocation2 + $0x20] sm:$0x1]  ;;  %v1662_v24 = vld [vmem:[#allocation2 + $0x3c] sm:$0xe] }
  0x8d   : > { %v1513_v42 = vrot.slane %v1511_v33, 4  ;;  %v1517_v52 = vshll.u32 %v1391_v27, 16  ;;  %v1402_v46 = vshrl.u32 %v1377_v34, 16  ;;  %v1405_v47 = vshll.u32 %v1377_v34, 16  ;;  %v3004_v25 = vld [vmem:[#allocation2 + $0x18] sm:$0xff]  }
  0x8e   : > { %1101 = vrot.lane.b32.xlu1 %v2746_v35, %s3132_s29  ;;  %v984_v44 = vsel %vm3477_vm14, %v979_v36, %v983_v22  ;;  %v989_v45 = vrot.slane %v988_v37, 4  ;;  %v1504_v48 = vor.u32 %v1503_v39, %v1500_v56  ;;  %v1411_v53 = vshll.u32 %v1378_v38, 16  ;;  %v1663_v30 = vld [vmem:[#allocation2 + $0x40] sm:$0xf]  ;;  %v1664_v35 = vld [vmem:[#allocation2 + $0x44] sm:$0x1] }
  0x8f   : > { %v1514_v49 = vor.u32 %v1513_v42, %v1509_v41  ;;  %v1519_v50 = vrot.slane %v1517_v52, 5  ;;  %v1404_v57 = vrot.slane %v1402_v46, 4  ;;  %v1407_v58 = vrot.slane %v1405_v47, 5  ;;  %v1650_v39 = vld [vmem:[#allocation2 + $0xc] sm:$0xe] }
  0x90   : > { %v994_v55 = vsel %vm3477_vm14, %v989_v45, %v993_v31  ;;  %v1415_v59 = vshrl.u32 %v1378_v38, 16  ;;  %v1505_v62 = vrot.slane %v1504_v48, 4  ;;  %v1413_v0 = vrot.slane %v1411_v53, 5  ;;  %v1651_v45 = vld [vmem:[#allocation2 + $0x10] sm:$0xf] }
  0x91   : > { %v2745_v61 = vcombine.low %v984_v44, %v994_v55  ;;  %v1515_v63 = vrot.slane %v1514_v49, 4  ;;  %v1408_v4 = vor.u32 %v1407_v58, %v1404_v57  ;;  %v1421_v6 = vshll.u32 %v1379_v51, 16  ;;  %v1666_v51 = vld [vmem:[#allocation2 + $0x4c] sm:$0xf] }
  0x92   : > { %1352 = vrot.lane.b32.xlu1 %v3001_v1, %s3133_s12  ;;  %v1417_v5 = vrot.slane %v1415_v59, 4  ;;  %v1522_v7 = vshrl.u32 %v1392_v54, 16  ;;  %v1510_v8 = vsel %vm3477_vm14, %v1505_v62, %v1509_v41  ;;  %v1525_v11 = vshll.u32 %v1392_v54, 16  ;;  %v1652_v1 = vld [vmem:[#allocation2 + $0x14] sm:$0x1] }
  0x93   : > { %1099 = vrot.lane.b32.xlu0 %v2745_v61, %s3132_s29  ;;  %v1520_v9 = vsel %vm3477_vm14, %v1515_v63, %v1519_v50  ;;  %v1531_v12 = vshll.u32 %v1393_v60, 16  ;;  %v1409_v15 = vrot.slane %v1408_v4, 4  ;;  %v1423_v17 = vrot.slane %v1421_v6, 5  ;;  %v1665_v50 = vld [vmem:[#allocation2 + $0x48] sm:$0xe] }
  0x94   : > { %v2777_v14 = vcombine.low %v1510_v8, %v1520_v9  ;;  %v1418_v16 = vor.u32 %v1417_v5, %v1413_v0  ;;  %v1524_v19 = vrot.slane %v1522_v7, 4  ;;  %v1527_v20 = vrot.slane %v1525_v11, 5  ;;  %v1667_v62 = vld [vmem:[#allocation2 + $0x50] sm:$0x1]  ;;  %v1653_v4 = vld [vmem:[#allocation2 + $0x18] sm:$0xe] }
  0x95   : > { %v1533_v21 = vrot.slane %v1531_v12, 5  ;;  %v1535_v22 = vshrl.u32 %v1393_v60, 16  ;;  %v1414_v26 = vsel %vm3477_vm14, %v1409_v15, %v1413_v0  ;;  %v1541_v28 = vshll.u32 %v1394_v10, 16  ;;  %v1654_v5 = vld [vmem:[#allocation2 + $0x1c] sm:$0xf] }
  0x96   : > { %1354 = vrot.lane.b32.xlu1 %v3003_v3, %s3133_s12  ;;  %v1419_v27 = vrot.slane %v1418_v16, 4  ;;  %v1426_v29 = vshrl.u32 %v1380_v13, 16  ;;  %v1528_v31 = vor.u32 %v1527_v20, %v1524_v19  ;;  %v1429_v33 = vshll.u32 %v1380_v13, 16  ;;  %v1655_v6 = vld [vmem:[#allocation2 + $0x20] sm:$0x1] }
  0x97   : > { %1344 = vrot.lane.b32.xlu0 %v3002_v2, %s3133_s12  ;;  %v1537_v32 = vrot.slane %v1535_v22, 4  ;;  %v1435_v34 = vshll.u32 %v1381_v18, 16  ;;  %v1543_v37 = vrot.slane %v1541_v28, 5  ;;  %v1439_v38 = vshrl.u32 %v1381_v18, 16  ;;  %v1913_v19 = vld [vmem:[#allocation2 + $0x48] sm:$0xf] }
  0x98   : > { %v1424_v36 = vsel %vm3477_vm14, %v1419_v27, %v1423_v17  ;;  %v1428_v56 = vrot.slane %v1426_v29, 4  ;;  %v1529_v42 = vrot.slane %v1528_v31, 4  ;;  %v1431_v44 = vrot.slane %v1429_v33, 5  ;;  %v1915_v29 = vld [vmem:[#allocation2 + $0x50] sm:$0x1] }
  0x99   : > { %v2773_v41 = vcombine.low %v1414_v26, %v1424_v36  ;;  %v1538_v52 = vor.u32 %v1537_v32, %v1533_v21  ;;  %v1437_v46 = vrot.slane %v1435_v34, 5  ;;  %v1441_v47 = vrot.slane %v1439_v38, 4  ;;  %v1901_v34 = vld [vmem:[#allocation2 + $0x18] sm:$0xf]  ;;  %v1902_v38 = vld [vmem:[#allocation2 + $0x1c] sm:$0xf] }
  0x9a   : > { %1625 = vrot.lane.b32.xlu1 %v2777_v14, %s3134_s14  ;;  %v1445_v48 = vshll.u32 %v1382_v23, 16  ;;  %v2785_v49 = vrot.slane %v1662_v24, 9  ;;  %v1534_v53 = vsel %vm3477_vm14, %v1529_v42, %v1533_v21  ;;  %v1432_v55 = vor.u32 %v1431_v44, %v1428_v56  ;;  %v1914_v24 = vld [vmem:[#allocation2 + $0x4c] sm:$0xf]  ;;  %v1903_v44 = vld [vmem:[#allocation2 + $0x20] sm:$0x1] }
  0x9b   : > { %1346 = vrot.lane.b32.xlu0 %v3004_v25, %s3133_s12  ;;  %v1539_v54 = vrot.slane %v1538_v52, 4  ;;  %v1728_v57 = vrot.slane %v1663_v30, 5  ;;  %v1442_v58 = vor.u32 %v1441_v47, %v1437_v46  ;;  %v1731_v60 = vrot.slane %v1664_v35, 5 }
  0x9c   : > { %v1447_v59 = vrot.slane %v1445_v48, 5  ;;  %v2781_v61 = vrot.slane %v1650_v39, 9  ;;  %v1433_v0 = vrot.slane %v1432_v55, 4  ;;  %v1700_v9 = vrot.slane %v1651_v45, 5  ;;  %v1916_v48 = vld [vmem:[#allocation2 + $0x54] sm:$0xf] }
  0x9d   : > { %v1544_v63 = vsel %vm3477_vm14, %v1539_v54, %v1543_v37  ;;  %v1729_v2 = vsel %vm3451_vm11, %v2785_v49, %v1728_v57  ;;  %v1730_v3 = vrot.slane %v1728_v57, 4  ;;  %v1443_v8 = vrot.slane %v1442_v58, 4 }
  0x9e   : > { %v2778_v7 = vcombine.low %v1534_v53, %v1544_v63  ;;  %v1703_v10 = vrot.slane %v1652_v1, 5  ;;  %v1438_v11 = vsel %vm3477_vm14, %v1433_v0, %v1437_v46  ;;  %v2786_v13 = vrot.slane %v1665_v50, 9  ;;  %v3005_v50 = vld [vmem:[#allocation2 + $0x48] sm:$0xff]   ;;  %v1918_v0 = vld [vmem:[#allocation2 + $0x5c] sm:$0x1] }
  0x9f   : > { %1617 = vrot.lane.b32.xlu0 %v2773_v41, %s3134_s14  ;;  %v1732_v12 = vsel %vm3451_vm11, %v1730_v3, %v1731_v60  ;;  %v1735_v14 = vrot.slane %v1666_v51, 5  ;;  %v1448_v15 = vsel %vm3477_vm14, %v1443_v8, %v1447_v59  ;;  %v1701_v17 = vsel %vm3451_vm11, %v2781_v61, %v1700_v9  ;;  %v1917_v60 = vld [vmem:[#allocation2 + $0x58] sm:$0xf] }
  0xa0   : > { %1627 = vrot.lane.b32.xlu1 %v2778_v7, %s3134_s14  ;;  %v2793_v16 = vcombine.low %v1729_v2, %v1732_v12  ;;  %v1702_v18 = vrot.slane %v1700_v9, 4  ;;  %v2774_v20 = vcombine.low %v1438_v11, %v1448_v15  ;;  %v1738_v23 = vrot.slane %v1667_v62, 5  ;;  %v1904_v7 = vld [vmem:[#allocation2 + $0x24] sm:$0xf]  ;;  %v3006_v8 = vld [vmem:[#allocation2 + $0x18] sm:$0xff]  }
  0xa1   : > { %v1736_v21 = vsel %vm3451_vm11, %v2786_v13, %v1735_v14  ;;  %v1737_v22 = vrot.slane %v1735_v14, 4  ;;  %v2782_v26 = vrot.slane %v1653_v4, 9  ;;  %v1707_v27 = vrot.slane %v1654_v5, 5  ;;  %v3007_v13 = vld [vmem:[#allocation2 + $0x54] sm:$0xff]  }
  0xa2   : > { %v1704_v25 = vsel %vm3451_vm11, %v1702_v18, %v1703_v10  ;;  %v1710_v28 = vrot.slane %v1655_v6, 5  ;;  %v2022_v32 = vshrl.u32 %v1913_v19, 16  ;;  %v2025_v33 = vshll.u32 %v1913_v19, 16 }
  0xa3   : > { %1619 = vrot.lane.b32.xlu0 %v2774_v20, %s3134_s14  ;;  %v2789_v30 = vcombine.low %v1701_v17, %v1704_v25  ;;  %v1739_v31 = vsel %vm3451_vm11, %v1737_v22, %v1738_v23  ;;  %v1708_v36 = vsel %vm3451_vm11, %v2782_v26, %v1707_v27  ;;  %v1709_v37 = vrot.slane %v1707_v27, 4  ;;  %v3008_v23 = vld [vmem:[#allocation2 + $0x24] sm:$0xff]  }
  0xa4   : > { %1786 = vrot.lane.b32.xlu1 %v2793_v16, %s3135_s15  ;;  %v2794_v35 = vcombine.low %v1736_v21, %v1739_v31  ;;  %v2031_v56 = vshll.u32 %v1914_v24, 16  ;;  %v2024_v39 = vrot.slane %v2022_v32, 4  ;;  %v2027_v41 = vrot.slane %v2025_v33, 5  ;;  %v1905_v21 = vld [vmem:[#allocation2 + $0x28] sm:$0xf] }
  0xa5   : > { %v2035_v42 = vshrl.u32 %v1914_v24, 16  ;;  %v2041_v52 = vshll.u32 %v1915_v29, 16  ;;  %v1711_v45 = vsel %vm3451_vm11, %v1709_v37, %v1710_v28  ;;  %v1926_v46 = vshrl.u32 %v1901_v34, 16  ;;  %v1906_v28 = vld [vmem:[#allocation2 + $0x2c] sm:$0x1] }
  0xa6   : > { %v2033_v1 = vrot.slane %v2031_v56, 5  ;;  %v1929_v47 = vshll.u32 %v1901_v34, 16  ;;  %v2790_v49 = vcombine.low %v1708_v36, %v1711_v45  ;;  %v2028_v51 = vor.u32 %v2027_v41, %v2024_v39  ;;  %v2186_v29 = vld [vmem:[#allocation2 + $0x48] sm:$0xe]  ;;  %v2187_v34 = vld [vmem:[#allocation2 + $0x4c] sm:$0xf] }
  0xa7   : > { %1778 = vrot.lane.b32.xlu0 %v2789_v30, %s3135_s15  ;;  %v2037_v53 = vrot.slane %v2035_v42, 4  ;;  %v2043_v54 = vrot.slane %v2041_v52, 5  ;;  %v1928_v55 = vrot.slane %v1926_v46, 4  ;;  %v1935_v58 = vshll.u32 %v1902_v38, 16  ;;  %v2175_v45 = vld [vmem:[#allocation2 + $0x1c] sm:$0xf] }
  0xa8   : > { %1788 = vrot.lane.b32.xlu1 %v2794_v35, %s3135_s15  ;;  %v1931_v57 = vrot.slane %v1929_v47, 5  ;;  %v1939_v59 = vshrl.u32 %v1902_v38, 16  ;;  %v2029_v61 = vrot.slane %v2028_v51, 4  ;;  %v1945_v63 = vshll.u32 %v1903_v44, 16  ;;  %v2188_v38 = vld [vmem:[#allocation2 + $0x50] sm:$0x1] }
  0xa9   : > { %v2038_v62 = vor.u32 %v2037_v53, %v2033_v1  ;;  %v2046_v2 = vshrl.u32 %v1916_v48, 16  ;;  %v1937_v4 = vrot.slane %v1935_v58, 5  ;;  %v2049_v6 = vshll.u32 %v1916_v48, 16  ;;  %v2174_v44 = vld [vmem:[#allocation2 + $0x18] sm:$0xe] }
  0xaa   : > { %v1932_v3 = vor.u32 %v1931_v57, %v1928_v55  ;;  %v1941_v5 = vrot.slane %v1939_v59, 4  ;;  %v2034_v9 = vsel %vm3477_vm14, %v2029_v61, %v2033_v1  ;;  %v1947_v11 = vrot.slane %v1945_v63, 5 }
  0xab   : > { %1780 = vrot.lane.b32.xlu0 %v2790_v49, %s3135_s15  ;;  %v2039_v10 = vrot.slane %v2038_v62, 4  ;;  %v2048_v12 = vrot.slane %v2046_v2, 4  ;;  %v2051_v16 = vrot.slane %v2049_v6, 5  ;;  %v2055_v17 = vshll.u32 %v1917_v60, 16  ;;  %v867_v2 = vld [vmem:[#allocation2 + $0x4c] sm:$0xf] }
  0xac   : > { %1876 = vrot.lane.b32.xlu1 %v3005_v50, %s3136_s17  ;;  %v1933_v14 = vrot.slane %v1932_v3, 4  ;;  %v1942_v15 = vor.u32 %v1941_v5, %v1937_v4  ;;  %v2059_v19 = vshrl.u32 %v1917_v60, 16  ;;  %v2065_v20 = vshll.u32 %v1918_v0, 16  ;;  %v866_v60 = vld [vmem:[#allocation2 + $0x48] sm:$0xf] }
  0xad   : > { %v2044_v18 = vsel %vm3477_vm14, %v2039_v10, %v2043_v54  ;;  %v1950_v22 = vshrl.u32 %v1904_v7, 16  ;;  %v2052_v27 = vor.u32 %v2051_v16, %v2048_v12  ;;  %v2057_v30 = vrot.slane %v2055_v17, 5  ;;  %v2176_v54 = vld [vmem:[#allocation2 + $0x20] sm:$0x1]  ;;  %v854_v16 = vld [vmem:[#allocation2 + $0x18] sm:$0xf] }
  0xae   : > { %v2809_v24 = vcombine.low %v2034_v9, %v2044_v18  ;;  %v1938_v25 = vsel %vm3477_vm14, %v1933_v14, %v1937_v4  ;;  %v1943_v26 = vrot.slane %v1942_v15, 4  ;;  %v2061_v31 = vrot.slane %v2059_v19, 4 }
  0xaf   : > { %1868 = vrot.lane.b32.xlu0 %v3006_v8, %s3136_s17  ;;  %v2067_v32 = vrot.slane %v2065_v20, 5  ;;  %v1952_v33 = vrot.slane %v1950_v22, 4  ;;  %v2053_v36 = vrot.slane %v2052_v27, 4  ;;  %v1953_v37 = vshll.u32 %v1904_v7, 16  ;;  %v856_v22 = vld [vmem:[#allocation2 + $0x20] sm:$0x1] }
  0xb0   : > { %1878 = vrot.lane.b32.xlu1 %v3007_v13, %s3136_s17  ;;  %v1948_v35 = vsel %vm3477_vm14, %v1943_v26, %v1947_v11  ;;  %v1959_v56 = vshll.u32 %v1905_v21, 16  ;;  %v2062_v41 = vor.u32 %v2061_v31, %v2057_v30  ;;  %v1963_v42 = vshrl.u32 %v1905_v21, 16  ;;  %v868_v13 = vld [vmem:[#allocation2 + $0x50] sm:$0x1]  ;;  %v855_v21 = vld [vmem:[#allocation2 + $0x1c] sm:$0xf] }
  0xb1   : > { %v2805_v39 = vcombine.low %v1938_v25, %v1948_v35  ;;  %v1969_v52 = vshll.u32 %v1906_v28, 16  ;;  %v2058_v1 = vsel %vm3477_vm14, %v2053_v36, %v2057_v30  ;;  %v1955_v46 = vrot.slane %v1953_v37, 5  ;;  %v2189_v27 = vld [vmem:[#allocation2 + $0x54] sm:$0xe]  ;;  %v2191_v37 = vld [vmem:[#allocation2 + $0x5c] sm:$0x1] }
  0xb2   : > { %v1961_v47 = vrot.slane %v1959_v56, 5  ;;  %v2817_v48 = vrot.slane %v2186_v29, 9  ;;  %v2063_v49 = vrot.slane %v2062_v41, 4  ;;  %v1965_v50 = vrot.slane %v1963_v42, 4  ;;  %v2177_v42 = vld [vmem:[#allocation2 + $0x24] sm:$0xe] }
  0xb3   : > { %1870 = vrot.lane.b32.xlu0 %v3008_v23, %s3136_s17  ;;  %v1971_v51 = vrot.slane %v1969_v52, 5  ;;  %v2252_v53 = vrot.slane %v2187_v34, 5  ;;  %v1956_v55 = vor.u32 %v1955_v46, %v1952_v33  ;;  %v2255_v57 = vrot.slane %v2188_v38, 5  ;;  %v2178_v46 = vld [vmem:[#allocation2 + $0x28] sm:$0xf] }
  0xb4   : > { %2149 = vrot.lane.b32.xlu1 %v2809_v24, %s3137_s27  ;;  %v2813_v58 = vrot.slane %v2174_v44, 9  ;;  %v2224_v59 = vrot.slane %v2175_v45, 5  ;;  %v2068_v61 = vsel %vm3477_vm14, %v2063_v49, %v2067_v32  ;;  %v1966_v62 = vor.u32 %v1965_v50, %v1961_v47  ;;  %v2190_v32 = vld [vmem:[#allocation2 + $0x58] sm:$0xf] }
  0xb5   : > { %v2253_v63 = vsel %vm3451_vm11, %v2817_v48, %v2252_v53  ;;  %v2254_v0 = vrot.slane %v2252_v53, 4  ;;  %v2810_v3 = vcombine.low %v2058_v1, %v2068_v61  ;;  %v1957_v4 = vrot.slane %v1956_v55, 4 }
  0xb6   : > { %v2225_v5 = vsel %vm3451_vm11, %v2813_v58, %v2224_v59  ;;  %v2226_v6 = vrot.slane %v2224_v59, 4  ;;  %v1967_v7 = vrot.slane %v1966_v62, 4  ;;  %v2227_v9 = vrot.slane %v2176_v54, 5  ;;  %v869_v58 = vld [vmem:[#allocation2 + $0x54] sm:$0xf] }
  0xb7   : > { %2141 = vrot.lane.b32.xlu0 %v2805_v39, %s3137_s27  ;;  %v2256_v8 = vsel %vm3451_vm11, %v2254_v0, %v2255_v57  ;;  %v1020_v10 = vshrl.u32 %v866_v60, 16  ;;  %v1962_v11 = vsel %vm3477_vm14, %v1957_v4, %v1961_v47  ;;  %v1023_v14 = vshll.u32 %v866_v60, 16  ;;  %v870_v59 = vld [vmem:[#allocation2 + $0x58] sm:$0xf]  ;;  %v871_v0 = vld [vmem:[#allocation2 + $0x5c] sm:$0x1] }
  0xb8   : > { %2151 = vrot.lane.b32.xlu1 %v2810_v3, %s3137_s27  ;;  %v2825_v12 = vcombine.low %v2253_v63, %v2256_v8  ;;  %v1029_v15 = vshll.u32 %v867_v2, 16  ;;  %v1972_v17 = vsel %vm3477_vm14, %v1967_v7, %v1971_v51  ;;  %v2228_v18 = vsel %vm3451_vm11, %v2226_v6, %v2227_v9  ;;  %v2179_v51 = vld [vmem:[#allocation2 + $0x2c] sm:$0x1] }
  0xb9   : > { %v1022_v19 = vrot.slane %v1020_v10, 4  ;;  %v1033_v20 = vshrl.u32 %v867_v2, 16  ;;  %v2806_v23 = vcombine.low %v1962_v11, %v1972_v17  ;;  %v2821_v24 = vcombine.low %v2225_v5, %v2228_v18  ;;  %v857_v2 = vld [vmem:[#allocation2 + $0x24] sm:$0xf]  ;;  %v858_v11 = vld [vmem:[#allocation2 + $0x28] sm:$0xf] }
  0xba   : > { %v1025_v25 = vrot.slane %v1023_v14, 5  ;;  %v1031_v26 = vrot.slane %v1029_v15, 5  ;;  %v1039_v29 = vshll.u32 %v868_v13, 16  ;;  %v924_v30 = vshrl.u32 %v854_v16, 16 }
  0xbb   : > { %v1035_v28 = vrot.slane %v1033_v20, 4  ;;  %v927_v31 = vshll.u32 %v854_v16, 16  ;;  %2143 = vrot.lane.b32.xlu0 %v2806_v23, %s3137_s27  ;;  %v933_v34 = vshll.u32 %v855_v21, 16  ;;  %v937_v35 = vshrl.u32 %v855_v21, 16  ;;  %v859_v16 = vld [vmem:[#allocation2 + $0x2c] sm:$0x1] }
  0xbc   : > { %2310 = vrot.lane.b32.xlu1 %v2825_v12, %s3138_s30  ;;  %v1026_v33 = vor.u32 %v1025_v25, %v1022_v19  ;;  %v943_v36 = vshll.u32 %v856_v22, 16  ;;  %v1041_v38 = vrot.slane %v1039_v29, 5  ;;  %v926_v39 = vrot.slane %v924_v30, 4  ;;  %v1142_v21 = vld [vmem:[#allocation2 + $0x48] sm:$0xe] }
  0xbd   : > { %v1036_v56 = vor.u32 %v1035_v28, %v1031_v26  ;;  %v929_v41 = vrot.slane %v927_v31, 5  ;;  %v935_v44 = vrot.slane %v933_v34, 5  ;;  %v939_v45 = vrot.slane %v937_v35, 4  ;;  %v1143_v22 = vld [vmem:[#allocation2 + $0x4c] sm:$0xf] }
  0xbe   : > { %v1027_v52 = vrot.slane %v1026_v33, 4  ;;  %v945_v1 = vrot.slane %v943_v36, 5  ;;  %v2818_v49 = vrot.slane %v2189_v27, 9  ;;  %v2259_v50 = vrot.slane %v2190_v32, 5  ;;  %v1144_v31 = vld [vmem:[#allocation2 + $0x50] sm:$0x1] }
  0xbf   : > { %v1037_v47 = vrot.slane %v1036_v56, 4  ;;  %v930_v48 = vor.u32 %v929_v41, %v926_v39  ;;  %2302 = vrot.lane.b32.xlu0 %v2821_v24, %s3138_s30  ;;  %v940_v54 = vor.u32 %v939_v45, %v935_v44  ;;  %v2262_v55 = vrot.slane %v2191_v37, 5  ;;  %v1130_v36 = vld [vmem:[#allocation2 + $0x18] sm:$0xe]  ;;  %v1131_v41 = vld [vmem:[#allocation2 + $0x1c] sm:$0xf] }
  0xc0   : > { %v1032_v53 = vsel %vm3477_vm14, %v1027_v52, %v1031_v26  ;;  %v2814_v57 = vrot.slane %v2177_v42, 9  ;;  %v2260_v62 = vsel %vm3451_vm11, %v2818_v49, %v2259_v50  ;;  %v2261_v63 = vrot.slane %v2259_v50, 4  ;;  %v1145_v50 = vld [vmem:[#allocation2 + $0x54] sm:$0xe] }
  0xc1   : > { %v1042_v60 = vsel %vm3477_vm14, %v1037_v47, %v1041_v38  ;;  %v931_v61 = vrot.slane %v930_v48, 4  ;;  %v941_v4 = vrot.slane %v940_v54, 4  ;;  %v2231_v5 = vrot.slane %v2178_v46, 5 }
  0xc2   : > { %v2747_v3 = vcombine.low %v1032_v53, %v1042_v60  ;;  %v2234_v6 = vrot.slane %v2179_v51, 5  ;;  %v2263_v8 = vsel %vm3451_vm11, %v2261_v63, %v2262_v55  ;;  %v1044_v9 = vshrl.u32 %v869_v58, 16  ;;  %v1146_v51 = vld [vmem:[#allocation2 + $0x58] sm:$0xf]  ;;  %v1133_v63 = vld [vmem:[#allocation2 + $0x24] sm:$0xe] }
  0xc3   : > { %v936_v7 = vsel %vm3477_vm14, %v931_v61, %v935_v44  ;;  %v1047_v10 = vshll.u32 %v869_v58, 16  ;;  %v946_v12 = vsel %vm3477_vm14, %v941_v4, %v945_v1  ;;  %v2826_v13 = vcombine.low %v2260_v62, %v2263_v8  ;;  %v1132_v1 = vld [vmem:[#allocation2 + $0x20] sm:$0x1]  ;;  %v1147_v58 = vld [vmem:[#allocation2 + $0x5c] sm:$0x1] }
  0xc4   : > { %1103 = vrot.lane.b32.xlu1 %v2747_v3, %s3132_s29  ;;  %v2232_v14 = vsel %vm3451_vm11, %v2814_v57, %v2231_v5  ;;  %v2233_v15 = vrot.slane %v2231_v5, 4  ;;  %v2743_v17 = vcombine.low %v936_v7, %v946_v12  ;;  %v1046_v18 = vrot.slane %v1044_v9, 4  ;;  %v1134_v5 = vld [vmem:[#allocation2 + $0x28] sm:$0xf] }
  0xc5   : > { %v1049_v19 = vrot.slane %v1047_v10, 5  ;;  %v1053_v20 = vshll.u32 %v870_v59, 16  ;;  %v1057_v24 = vshrl.u32 %v870_v59, 16  ;;  %v1063_v25 = vshll.u32 %v871_v0, 16 }
  0xc6   : > { %v2235_v23 = vsel %vm3451_vm11, %v2233_v15, %v2234_v6  ;;  %v948_v26 = vshrl.u32 %v857_v2, 16  ;;  %1095 = vrot.lane.b32.xlu0 %v2743_v17, %s3132_s29  ;;  %v951_v30 = vshll.u32 %v857_v2, 16  ;;  %v957_v35 = vshll.u32 %v858_v11, 16  ;;  %v1135_v6 = vld [vmem:[#allocation2 + $0x2c] sm:$0x1] }
  0xc7   : > { %v2822_v27 = vcombine.low %v2232_v14, %v2235_v23  ;;  %v1050_v28 = vor.u32 %v1049_v19, %v1046_v18  ;;  %v1055_v29 = vrot.slane %v1053_v20, 5  ;;  %v1059_v32 = vrot.slane %v1057_v24, 4  ;;  %v1395_v15 = vld [vmem:[#allocation2 + $0x54] sm:$0xf]  ;;  %v1396_v20 = vld [vmem:[#allocation2 + $0x58] sm:$0xf] }
  0xc8   : > { %2312 = vrot.lane.b32.xlu1 %v2826_v13, %s3138_s30  ;;  %v1065_v33 = vrot.slane %v1063_v25, 5  ;;  %v950_v34 = vrot.slane %v948_v26, 4  ;;  %v953_v56 = vrot.slane %v951_v30, 5  ;;  %v961_v38 = vshrl.u32 %v858_v11, 16  ;;  %v1397_v25 = vld [vmem:[#allocation2 + $0x5c] sm:$0x1] }
  0xc9   : > { %v1051_v37 = vrot.slane %v1050_v28, 4  ;;  %v967_v39 = vshll.u32 %v859_v16, 16  ;;  %v1060_v42 = vor.u32 %v1059_v32, %v1055_v29  ;;  %v959_v52 = vrot.slane %v957_v35, 5  ;;  %v1383_v30 = vld [vmem:[#allocation2 + $0x24] sm:$0xf] }
  0xca   : > { %v2755_v44 = vrot.slane %v1142_v21, 9  ;;  %v1219_v45 = vrot.slane %v1143_v22, 5  ;;  %2304 = vrot.lane.b32.xlu0 %v2822_v27, %s3138_s30  ;;  %v954_v47 = vor.u32 %v953_v56, %v950_v34  ;;  %v963_v48 = vrot.slane %v961_v38, 4  ;;  %v1384_v35 = vld [vmem:[#allocation2 + $0x28] sm:$0xf] }
  0xcb   : > { %v1056_v46 = vsel %vm3477_vm14, %v1051_v37, %v1055_v29  ;;  %v969_v49 = vrot.slane %v967_v39, 5  ;;  %v1061_v53 = vrot.slane %v1060_v42, 4  ;;  %v1222_v57 = vrot.slane %v1144_v31, 5  ;;  %v1385_v39 = vld [vmem:[#allocation2 + $0x2c] sm:$0x1] }
  0xcc   : > { %v1220_v54 = vsel %vm3451_vm11, %v2755_v44, %v1219_v45  ;;  %v1221_v55 = vrot.slane %v1219_v45, 4  ;;  %v955_v59 = vrot.slane %v954_v47, 4  ;;  %v964_v60 = vor.u32 %v963_v48, %v959_v52  ;;  %v1398_v45 = vld [vmem:[#allocation2 + $0x60] sm:$0xf] }
  0xcd   : > { %v2751_v61 = vrot.slane %v1130_v36, 9  ;;  %v1191_v62 = vrot.slane %v1131_v41, 5  ;;  %v1066_v0 = vsel %vm3477_vm14, %v1061_v53, %v1065_v33  ;;  %v1194_v3 = vrot.slane %v1132_v1, 5  ;;  %v3009_v1 = vld [vmem:[#allocation2 + $0x54] sm:$0xff]  }
  0xce   : > { %v1223_v2 = vsel %vm3451_vm11, %v1221_v55, %v1222_v57  ;;  %v2756_v4 = vrot.slane %v1145_v50, 9  ;;  %v2748_v7 = vcombine.low %v1056_v46, %v1066_v0  ;;  %v960_v8 = vsel %vm3477_vm14, %v955_v59, %v959_v52  ;;  %v1399_v55 = vld [vmem:[#allocation2 + $0x64] sm:$0xf] }
  0xcf   : > { %v965_v9 = vrot.slane %v964_v60, 4  ;;  %v2763_v10 = vcombine.low %v1220_v54, %v1223_v2  ;;  %v1192_v11 = vsel %vm3451_vm11, %v2751_v61, %v1191_v62  ;;  %v1193_v12 = vrot.slane %v1191_v62, 4  ;;  %v1400_v60 = vld [vmem:[#allocation2 + $0x68] sm:$0x1]  ;;  %v1386_v62 = vld [vmem:[#allocation2 + $0x30] sm:$0xf] }
  0xd0   : > { %v1226_v13 = vrot.slane %v1146_v51, 5  ;;  %v1229_v14 = vrot.slane %v1147_v58, 5  ;;  %1105 = vrot.lane.b32.xlu1 %v2748_v7, %s3132_s29  ;;  %v2752_v17 = vrot.slane %v1133_v63, 9  ;;  %v1198_v18 = vrot.slane %v1134_v5, 5 }
  0xd1   : > { %v970_v16 = vsel %vm3477_vm14, %v965_v9, %v969_v49  ;;  %v1201_v19 = vrot.slane %v1135_v6, 5  ;;  %v1195_v22 = vsel %vm3451_vm11, %v1193_v12, %v1194_v3  ;;  %v1546_v29 = vshrl.u32 %v1395_v15, 16  ;;  %v3025_v9 = vld [vmem:[%s3968_s3] sm:$0xff]  }
  0xd2   : > { %v2744_v21 = vcombine.low %v960_v8, %v970_v16  ;;  %v1227_v23 = vsel %vm3451_vm11, %v2756_v4, %v1226_v13  ;;  %v1228_v24 = vrot.slane %v1226_v13, 4  ;;  %v2759_v26 = vcombine.low %v1192_v11, %v1195_v22  ;;  %v3628_v4 = vld [vmem:[#allocation2 + $0x34] sm:$0xf]  ;;  %2870 = vmatprep.subr.bf16.mxu0 %v3025_v9  ;;  %2902 = vmatprep.subr.bf16.mxu1 %v3025_v9 }
  0xd3   : > { %v1199_v27 = vsel %vm3451_vm11, %v2752_v17, %v1198_v18  ;;  %v1200_v28 = vrot.slane %v1198_v18, 4  ;;  %v1549_v32 = vshll.u32 %v1395_v15, 16  ;;  %v1555_v33 = vshll.u32 %v1396_v20, 16  ;;  %v3011_v15 = vld [vmem:[#allocation2 + $0x60] sm:$0xff]   ;;  %2871 = vmatpush3.bf16.msra.mxu0 %v3025_v9  ;;  %2910 = vmatpush3.bf16.msra.mxu1 %v3025_v9 }
  0xd4   : > { %1097 = vrot.lane.b32.xlu0 %v2744_v21, %s3132_s29  ;;  %v1230_v31 = vsel %vm3451_vm11, %v1228_v24, %v1229_v14  ;;  %v1559_v34 = vshrl.u32 %v1396_v20, 16  ;;  %1267 = vrot.lane.b32.xlu1 %v2763_v10, %s3131_s13  ;;  %v1548_v56 = vrot.slane %v1546_v29, 4  ;;  %v1565_v38 = vshll.u32 %v1397_v25, 16  ;;  %v3010_v10 = vld [vmem:[#allocation2 + $0x24] sm:$0xff]   ;;  %v1388_v20 = vld [vmem:[#allocation2 + $0x38] sm:$0x1] }
  0xd5   : > { %v2764_v36 = vcombine.low %v1227_v23, %v1230_v31  ;;  %v1202_v37 = vsel %vm3451_vm11, %v1200_v28, %v1201_v19  ;;  %v1551_v42 = vrot.slane %v1549_v32, 5  ;;  %v1557_v52 = vrot.slane %v1555_v33, 5  ;;  %v3012_v21 = vld [vmem:[#allocation2 + $0x30] sm:$0xff]   ;;  %v1669_v31 = vld [vmem:[#allocation2 + $0x58] sm:$0xf]  ;;  %s3912_s29 = scalar_lea.sflag [#allocation5], %s3991_s16 }
  0xd6   : > { %v2760_v41 = vcombine.low %v1199_v27, %v1202_v37  ;;  %v1561_v44 = vrot.slane %v1559_v34, 4  ;;  %v1567_v46 = vrot.slane %v1565_v38, 5  ;;  %v1450_v47 = vshrl.u32 %v1383_v30, 16  ;;  %v1656_v37 = vld [vmem:[#allocation2 + $0x24] sm:$0xe] }
  0xd7   : > { %v1453_v48 = vshll.u32 %v1383_v30, 16  ;;  %v1459_v49 = vshll.u32 %v1384_v35, 16  ;;  %v1552_v50 = vor.u32 %v1551_v42, %v1548_v56  ;;  %v1463_v53 = vshrl.u32 %v1384_v35, 16  ;;  %v1668_v30 = vld [vmem:[#allocation2 + $0x54] sm:$0xe] }
  0xd8   : > { %1259 = vrot.lane.b32.xlu0 %v2759_v26, %s3131_s13  ;;  %v1562_v51 = vor.u32 %v1561_v44, %v1557_v52  ;;  %v1469_v54 = vshll.u32 %v1385_v39, 16  ;;  %1269 = vrot.lane.b32.xlu1 %v2764_v36, %s3131_s13  ;;  %v1452_v57 = vrot.slane %v1450_v47, 4  ;;  %v1570_v61 = vshrl.u32 %v1398_v45, 16  ;;  %v1670_v36 = vld [vmem:[#allocation2 + $0x5c] sm:$0x1] }
  0xd9   : > { %v1455_v58 = vrot.slane %v1453_v48, 5  ;;  %v1461_v59 = vrot.slane %v1459_v49, 5  ;;  %v1553_v63 = vrot.slane %v1552_v50, 4  ;;  %v1465_v2 = vrot.slane %v1463_v53, 4  ;;  %v1657_v42 = vld [vmem:[#allocation2 + $0x28] sm:$0xf] }
  0xda   : > { %v1563_v0 = vrot.slane %v1562_v51, 4  ;;  %v1471_v3 = vrot.slane %v1469_v54, 5  ;;  %v1572_v6 = vrot.slane %v1570_v61, 4  ;;  %v1573_v7 = vshll.u32 %v1398_v45, 16  ;;  %v1658_v47 = vld [vmem:[#allocation2 + $0x2c] sm:$0x1] }
  0xdb   : > { %v1456_v5 = vor.u32 %v1455_v58, %v1452_v57  ;;  %v1579_v8 = vshll.u32 %v1399_v55, 16  ;;  %v1558_v11 = vsel %vm3477_vm14, %v1553_v63, %v1557_v52  ;;  %v1466_v13 = vor.u32 %v1465_v2, %v1461_v59  ;;  %v3026_v52 = vld [vmem:[%s3968_s3 + $0x8] sm:$0xff]   ;;  %v1671_v53 = vld [vmem:[#allocation2 + $0x60] sm:$0xe]  ;;  %v1672_v54 = vld [vmem:[#allocation2 + $0x64] sm:$0xf] }
  0xdc   : > { %1261 = vrot.lane.b32.xlu0 %v2760_v41, %s3131_s13  ;;  %v1568_v12 = vsel %vm3477_vm14, %v1563_v0, %v1567_v46  ;;  %v1583_v14 = vshrl.u32 %v1399_v55, 16  ;;  %1356 = vrot.lane.b32.xlu1 %v3009_v1, %s3133_s12  ;;  %v1575_v18 = vrot.slane %v1573_v7, 5  ;;  %v1589_v24 = vshll.u32 %v1400_v60, 16  ;;  %v1673_v60 = vld [vmem:[#allocation2 + $0x68] sm:$0x1]  ;;  %v3027_v61 = vld [vmem:[%s3968_s3 + $0x10] sm:$0xff]  }
  0xdd   : > { %v2779_v16 = vcombine.low %v1558_v11, %v1568_v12  ;;  %v1457_v17 = vrot.slane %v1456_v5, 4  ;;  %v1581_v19 = vrot.slane %v1579_v8, 5  ;;  %v1467_v22 = vrot.slane %v1466_v13, 4  ;;  %2872 = vmatprep.subr.bf16.mxu0 %v3026_v52  ;;  %2903 = vmatprep.subr.bf16.mxu1 %v3026_v52  ;;  %v1660_v8 = vld [vmem:[#allocation2 + $0x34] sm:$0xf] }
  0xde   : > { %v1585_v23 = vrot.slane %v1583_v14, 4  ;;  %v1474_v25 = vshrl.u32 %v1386_v62, 16  ;;  %v1576_v27 = vor.u32 %v1575_v18, %v1572_v6  ;;  %v1477_v28 = vshll.u32 %v1386_v62, 16  ;;  %2873 = vmatpush3.bf16.msra.mxu0 %v3026_v52  ;;  %2911 = vmatpush3.bf16.msra.mxu1 %v3026_v52  ;;  %v1661_v13 = vld [vmem:[#allocation2 + $0x38] sm:$0x1] }
  0xdf   : > { %v1462_v26 = vsel %vm3477_vm14, %v1457_v17, %v1461_v59  ;;  %v1483_v29 = vshll.u32 %v3628_v4, 16  ;;  %v1472_v32 = vsel %vm3477_vm14, %v1467_v22, %v1471_v3  ;;  %v1591_v34 = vrot.slane %v1589_v24, 5  ;;  %v1659_v3 = vld [vmem:[#allocation2 + $0x30] sm:$0xe]  ;;  %2874 = vmatprep.subr.bf16.mxu0 %v3027_v61  ;;  %2904 = vmatprep.subr.bf16.mxu1 %v3027_v61  ;;  %v1919_v14 = vld [vmem:[#allocation2 + $0x60] sm:$0xf] }
  0xe0   : > { %1348 = vrot.lane.b32.xlu0 %v3010_v10, %s3133_s12  ;;  %v1586_v33 = vor.u32 %v1585_v23, %v1581_v19  ;;  %v1476_v35 = vrot.slane %v1474_v25, 4  ;;  %1358 = vrot.lane.b32.xlu1 %v3011_v15, %s3133_s12  ;;  %v2775_v56 = vcombine.low %v1462_v26, %v1472_v32  ;;  %v1577_v38 = vrot.slane %v1576_v27, 4  ;;  %v1907_v25 = vld [vmem:[#allocation2 + $0x30] sm:$0xf]  ;;  %v3028_v26 = vld [vmem:[%s3968_s3 + $0x18] sm:$0xff]  }
  0xe1   : > { %v1479_v39 = vrot.slane %v1477_v28, 5  ;;  %v3646_v41 = vrot.slane %v1483_v29, 5  ;;  %v1487_v45 = vshrl.u32 %v3628_v4, 16  ;;  %v1493_v1 = vshll.u32 %v1388_v20, 16  ;;  %v1921_v20 = vld [vmem:[#allocation2 + $0x68] sm:$0x1] }
  0xe2   : > { %v1587_v44 = vrot.slane %v1586_v33, 4  ;;  %v2787_v46 = vrot.slane %v1668_v30, 9  ;;  %v1582_v48 = vsel %vm3477_vm14, %v1577_v38, %v1581_v19  ;;  %v1742_v50 = vrot.slane %v1669_v31, 5  ;;  %v1920_v19 = vld [vmem:[#allocation2 + $0x64] sm:$0xf]  ;;  %2875 = vmatpush3.bf16.msra.mxu0 %v3027_v61  ;;  %2912 = vmatpush3.bf16.msra.mxu1 %v3027_v61 }
  0xe3   : > { %v1480_v49 = vor.u32 %v1479_v39, %v1476_v35  ;;  %v1745_v51 = vrot.slane %v1670_v36, 5  ;;  %v1489_v57 = vrot.slane %v1487_v45, 4  ;;  %v1495_v58 = vrot.slane %v1493_v1, 5  ;;  %v1908_v31 = vld [vmem:[#allocation2 + $0x34] sm:$0xf]  ;;  %2876 = vmatprep.subr.bf16.mxu0 %v3028_v26  ;;  %2905 = vmatprep.subr.bf16.mxu1 %v3028_v26  ;;  %v3029_v39 = vld [vmem:[%s3968_s3 + $0x20] sm:$0xff]  }
  0xe4   : > { %1350 = vrot.lane.b32.xlu0 %v3012_v21, %s3133_s12  ;;  %v1592_v55 = vsel %vm3477_vm14, %v1587_v44, %v1591_v34  ;;  %v2783_v59 = vrot.slane %v1656_v37, 9  ;;  %1629 = vrot.lane.b32.xlu1 %v2779_v16, %s3134_s14  ;;  %v1743_v0 = vsel %vm3451_vm11, %v2787_v46, %v1742_v50  ;;  %v1744_v2 = vrot.slane %v1742_v50, 4  ;;  %v1909_v44 = vld [vmem:[#allocation2 + $0x38] sm:$0x1]  ;;  %v1922_v50 = vld [vmem:[#allocation2 + $0x6c] sm:$0xf] }
  0xe5   : > { %v2780_v62 = vcombine.low %v1582_v48, %v1592_v55  ;;  %v1481_v63 = vrot.slane %v1480_v49, 4  ;;  %v1490_v4 = vor.u32 %v1489_v57, %v3646_v41  ;;  %v1714_v5 = vrot.slane %v1657_v42, 5  ;;  %v1923_v57 = vld [vmem:[#allocation2 + $0x70] sm:$0xf]  ;;  %s3140_s12 = smov [#allocation4]  }
  0xe6   : > { %v1717_v6 = vrot.slane %v1658_v47, 5  ;;  %v2788_v7 = vrot.slane %v1671_v53, 9  ;;  %v1746_v10 = vsel %vm3451_vm11, %v1744_v2, %v1745_v51  ;;  %v1749_v11 = vrot.slane %v1672_v54, 5  ;;  %2877 = vmatpush3.bf16.msra.mxu0 %v3028_v26  ;;  %2913 = vmatpush3.bf16.msra.mxu1 %v3028_v26 }
  0xe7   : > { %v1486_v9 = vsel %vm3477_vm14, %v1481_v63, %v3646_v41  ;;  %v1752_v12 = vrot.slane %v1673_v60, 5  ;;  %v1491_v15 = vrot.slane %v1490_v4, 4  ;;  %v2795_v16 = vcombine.low %v1743_v0, %v1746_v10  ;;  %2878 = vmatprep.subr.bf16.mxu0 %v3029_v39  ;;  %2906 = vmatprep.subr.bf16.mxu1 %v3029_v39  ;;  %v3030_v63 = vld [vmem:[%s3968_s3 + $0x28] sm:$0xff]   ;;  %v3013_v0 = vld [vmem:[#allocation2 + $0x60] sm:$0xff]  }
  0xe8   : > { %1621 = vrot.lane.b32.xlu0 %v2775_v56, %s3134_s14  ;;  %v1715_v17 = vsel %vm3451_vm11, %v2783_v59, %v1714_v5  ;;  %v1716_v18 = vrot.slane %v1714_v5, 4  ;;  %1631 = vrot.lane.b32.xlu1 %v2780_v62, %s3134_s14  ;;  %v1750_v21 = vsel %vm3451_vm11, %v2788_v7, %v1749_v11  ;;  %v1751_v22 = vrot.slane %v1749_v11, 4  ;;  %v1924_v62 = vld [vmem:[#allocation2 + $0x74] sm:$0x1] }
  0xe9   : > { %v2784_v23 = vrot.slane %v1659_v3, 9  ;;  %v1721_v24 = vrot.slane %v1660_v8, 5  ;;  %v1496_v27 = vsel %vm3477_vm14, %v1491_v15, %v1495_v58  ;;  %v1724_v29 = vrot.slane %v1661_v13, 5  ;;  %v3014_v11 = vld [vmem:[#allocation2 + $0x30] sm:$0xff]  }
  0xea   : > { %v1718_v28 = vsel %vm3451_vm11, %v1716_v18, %v1717_v6  ;;  %v2070_v30 = vshrl.u32 %v1919_v14, 16  ;;  %v2776_v32 = vcombine.low %v1486_v9, %v1496_v27  ;;  %v1753_v34 = vsel %vm3451_vm11, %v1751_v22, %v1752_v12  ;;  %2879 = vmatpush3.bf16.msra.mxu0 %v3029_v39  ;;  %v1910_v6 = vld [vmem:[#allocation2 + $0x3c] sm:$0xf]  ;;  %2914 = vmatpush3.bf16.msra.mxu1 %v3029_v39  ;;  %v3015_v12 = vld [vmem:[#allocation2 + $0x6c] sm:$0xff]   ;;  %v1911_v18 = vld [vmem:[#allocation2 + $0x40] sm:$0xf] }
  0xeb   : > { %v2791_v33 = vcombine.low %v1715_v17, %v1718_v28  ;;  %v3686_v35 = vsel %vm3451_vm11, %v2784_v23, %v1721_v24  ;;  %v2796_v36 = vcombine.low %v1750_v21, %v1753_v34  ;;  %v1723_v37 = vrot.slane %v1721_v24, 4  ;;  %v3695_v49 = vpop.permute.xlu1 %1263  ;;  %2880 = vmatprep.subr.bf16.mxu0 %v3030_v63  ;;  %2907 = vmatprep.subr.bf16.mxu1 %v3030_v63  ;;  %v1912_v23 = vld [vmem:[#allocation2 + $0x44] sm:$0x1]  ;;  %v3724_v34 = vld [vmem:[#allocation2 + $0x60] sm:$0xe] }
  0xec   : > { %v2072_v56 = vrot.slane %v2070_v30, 4  ;;  %v2073_v38 = vshll.u32 %v1919_v14, 16  ;;  %1623 = vrot.lane.b32.xlu0 %v2776_v32, %s3134_s14  ;;  %1790 = vrot.lane.b32.xlu1 %v2795_v16, %s3135_s15  ;;  %v2079_v41 = vshll.u32 %v1920_v19, 16  ;;  %v2083_v42 = vshrl.u32 %v1920_v19, 16  ;;  %v2193_v39 = vld [vmem:[#allocation2 + $0x64] sm:$0xf] }
  0xed   : > { %v2089_v52 = vshll.u32 %v1921_v20, 16  ;;  %v1974_v45 = vshrl.u32 %v1907_v25, 16  ;;  %v1725_v1 = vsel %vm3451_vm11, %v1723_v37, %v1724_v29  ;;  %v1977_v47 = vshll.u32 %v1907_v25, 16  ;;  %v3705_v16 = vpop.permute.xlu0 %1255  ;;  %v3031_v25 = vld [vmem:[%s3968_s3 + $0x30] sm:$0xff]  }
  0xee   : > { %v2075_v46 = vrot.slane %v2073_v38, 5  ;;  %v1983_v48 = vshll.u32 %v1908_v31, 16  ;;  %v2792_v51 = vcombine.low %v3686_v35, %v1725_v1  ;;  %v2081_v53 = vrot.slane %v2079_v41, 5  ;;  %2881 = vmatpush3.bf16.msra.mxu0 %v3030_v63  ;;  %2915 = vmatpush3.bf16.msra.mxu1 %v3030_v63  ;;  %v3016_v35 = vld [vmem:[#allocation2 + $0x3c] sm:$0xff]   ;;  %v3726_v41 = vld [vmem:[#allocation2 + $0x68] sm:$0x1] }
  0xef   : > { %v2085_v54 = vrot.slane %v2083_v42, 4  ;;  %v2091_v55 = vrot.slane %v2089_v52, 5  ;;  %v1976_v59 = vrot.slane %v1974_v45, 4  ;;  %v1979_v60 = vrot.slane %v1977_v47, 5  ;;  %v3711_v24 = vpop.permute.xlu1 %1265  ;;  %2882 = vmatprep.subr.bf16.mxu0 %v3031_v25  ;;  %v3728_v42 = vld [vmem:[#allocation2 + $0x30] sm:$0xe]  ;;  %2908 = vmatprep.subr.bf16.mxu1 %v3031_v25 }
  0xf0   : > { %v2076_v58 = vor.u32 %v2075_v46, %v2072_v56  ;;  %v3698_v61 = vrot.slane %v1983_v48, 5  ;;  %1782 = vrot.lane.b32.xlu0 %v2791_v33, %s3135_s15  ;;  %1792 = vrot.lane.b32.xlu1 %v2796_v36, %s3135_s15  ;;  %v1987_v3 = vshrl.u32 %v1908_v31, 16  ;;  %v1993_v4 = vshll.u32 %v1909_v44, 16  ;;  %v3730_v46 = vld [vmem:[#allocation2 + $0x34] sm:$0xf] }
  0xf1   : > { %v2086_v2 = vor.u32 %v2085_v54, %v2081_v53  ;;  %v2094_v5 = vshrl.u32 %v1922_v50, 16  ;;  %v1980_v8 = vor.u32 %v1979_v60, %v1976_v59  ;;  %v2097_v9 = vshll.u32 %v1922_v50, 16  ;;  %v3732_v47 = vld [vmem:[#allocation2 + $0x38] sm:$0x1]  ;;  %v3739_v54 = vpop.permute.xlu0 %1257 }
  0xf2   : > { %v2077_v7 = vrot.slane %v2076_v58, 4  ;;  %v2103_v10 = vshll.u32 %v1923_v57, 16  ;;  %v1989_v14 = vrot.slane %v1987_v3, 4  ;;  %v1995_v15 = vrot.slane %v1993_v4, 5  ;;  %2883 = vmatpush3.bf16.msra.mxu0 %v3031_v25  ;;  %2916 = vmatpush3.bf16.msra.mxu1 %v3031_v25  ;;  %v3018_v3 = vld [vmem:[#allocation2] sm:$0xff]  }
  0xf3   : > { %v2087_v13 = vrot.slane %v2086_v2, 4  ;;  %v2096_v17 = vrot.slane %v2094_v5, 4  ;;  %v1981_v20 = vrot.slane %v1980_v8, 4  ;;  %v2099_v21 = vrot.slane %v2097_v9, 5  ;;  %v3017_v2 = vld [vmem:[#allocation2 + $0xc] sm:$0xff]   ;;  %v3019_v5 = vld [vmem:[#allocation2 + $0x3c] sm:$0xff]  }
  0xf4   : > { %v2082_v19 = vsel %vm3477_vm14, %v2077_v7, %v2081_v53  ;;  %v3709_v22 = vrot.slane %v2103_v10, 5  ;;  %1784 = vrot.lane.b32.xlu0 %v2792_v51, %s3135_s15  ;;  %1880 = vrot.lane.b32.xlu1 %v3013_v0, %s3136_s17  ;;  %v1990_v27 = vor.u32 %v1989_v14, %v3698_v61  ;;  %v2107_v28 = vshrl.u32 %v1923_v57, 16  ;;  %v3747_v4 = vld [vmem:[#allocation2 + $0x6c] sm:$0xe]  ;;  %v3022_v8 = vld [vmem:[#allocation2 + $0x18] sm:$0xff]   ;;  %v3024_v25 = vld [vmem:[#allocation2 + $0x24] sm:$0xff]  }
  0xf5   : > { %v2092_v26 = vsel %vm3477_vm14, %v2087_v13, %v2091_v55  ;;  %v2113_v29 = vshll.u32 %v1924_v62, 16  ;;  %v1986_v31 = vsel %vm3477_vm14, %v1981_v20, %v3698_v61  ;;  %v2100_v32 = vor.u32 %v2099_v21, %v2096_v17  ;;  %v3021_v7 = vld [vmem:[#allocation2 + $0x48] sm:$0xff]   ;;  %v3032_v9 = vld [vmem:[%s3968_s3 + $0x38] sm:$0xff]   ;;  %v2196_v14 = vld [vmem:[#allocation2 + $0x70] sm:$0xf]  ;;  %s3033_s15 = scalar_lea.vmem %s3906_s22, 2048 }
  0xf6   : > { %v2811_v30 = vcombine.low %v2082_v19, %v2092_v26  ;;  %v1998_v33 = vshrl.u32 %v1910_v6, 16  ;;  %v1991_v36 = vrot.slane %v1990_v27, 4  ;;  %v2109_v37 = vrot.slane %v2107_v28, 4  ;;  %v2197_v21 = vld [vmem:[#allocation2 + $0x74] sm:$0x1]  ;;  %2884 = vmatprep.subr.bf16.mxu0 %v3032_v9  ;;  %2909 = vmatprep.subr.bf16.mxu1 %v3032_v9  ;;  %p3034_p9 = scmp.ne.s32.totalorder %s3906_s22, %s3033_s15 }
  0xf7   : > { %v2115_v56 = vrot.slane %v2113_v29, 5  ;;  %v2001_v38 = vshll.u32 %v1910_v6, 16  ;;  %v2101_v52 = vrot.slane %v2100_v32, 4  ;;  %v2007_v45 = vshll.u32 %v1911_v18, 16  ;;  %v3020_v6 = vld [vmem:[#allocation2 + $0x30] sm:$0xff]   ;;  %2885 = vmatpush3.bf16.msra.mxu0 %v3032_v9  ;;  %2917 = vmatpush3.bf16.msra.mxu1 %v3032_v9 }
  0xf8   : > { %v2000_v44 = vrot.slane %v1998_v33, 4  ;;  %v2011_v1 = vshrl.u32 %v1911_v18, 16  ;;  %1872 = vrot.lane.b32.xlu0 %v3014_v11, %s3136_s17  ;;  %1882 = vrot.lane.b32.xlu1 %v3015_v12, %s3136_s17  ;;  %v1996_v48 = vsel %vm3477_vm14, %v1991_v36, %v1995_v15  ;;  %v2110_v50 = vor.u32 %v2109_v37, %v3709_v22  ;;  %v3023_v15 = vld [vmem:[#allocation2 + $0x54] sm:$0xff]   ;;  %p3035_p10 = pnand %p3034_p9, %p3223_p3 }
  0xf9   : > { %v2003_v51 = vrot.slane %v2001_v38, 5  ;;  %v2017_v53 = vshll.u32 %v1912_v23, 16  ;;  %v2807_v55 = vcombine.low %v1986_v31, %v1996_v48  ;;  %v2106_v57 = vsel %vm3477_vm14, %v2101_v52, %v3709_v22  ;;  %v3744_v60 = vpop.permute.xlu1 %1093  ;;  %v2183_v22 = vld [vmem:[#allocation2 + $0x3c] sm:$0xe]  ;;  %v2184_v23 = vld [vmem:[#allocation2 + $0x40] sm:$0xf] }
  0xfa   : > { %v2009_v58 = vrot.slane %v2007_v45, 5  ;;  %v2013_v59 = vrot.slane %v2011_v1, 4  ;;  %v2111_v61 = vrot.slane %v2110_v50, 4  ;;  %v2819_v0 = vrot.slane %v3724_v34, 9  ;;  %v2185_v31 = vld [vmem:[#allocation2 + $0x44] sm:$0x1]  ;;  %p3036_p11 = pneg %p3035_p10 }
  0xfb   : > { %v2004_v62 = vor.u32 %v2003_v51, %v2000_v44  ;;  %v2019_v63 = vrot.slane %v2017_v53, 5  ;;  %v2266_v11 = vrot.slane %v2193_v39, 5  ;;  %v2269_v12 = vrot.slane %v3726_v41, 5  ;;  %v1092_v33 = vpop.permute.xlu0 %1091 }
  0xfc   : > { %v2014_v10 = vor.u32 %v2013_v59, %v2009_v58  ;;  %v2815_v13 = vrot.slane %v3728_v42, 9  ;;  %1874 = vrot.lane.b32.xlu0 %v3016_v35, %s3136_s17  ;;  %2153 = vrot.lane.b32.xlu1 %v2811_v30, %s3137_s27  ;;  %v2116_v17 = vsel %vm3477_vm14, %v2111_v61, %v2115_v56  ;;  %v2238_v19 = vrot.slane %v3730_v46, 5  ;;  %s3037_s17 = sshll.u32 %s3140_s12, 4  ;;  %s3038_s17 = int_to_ptr.vmem [resolvable:$false] %s3037_s17 }
  0xfd   : > { %v2005_v18 = vrot.slane %v2004_v62, 4  ;;  %v2241_v20 = vrot.slane %v3732_v47, 5  ;;  %v2812_v26 = vcombine.low %v2106_v57, %v2116_v17  ;;  %v2267_v28 = vsel %vm3451_vm11, %v2819_v0, %v2266_v11  ;;  %p3040_p12 = scmp.lt.s32.totalorder %s3906_s22, %s3038_s17 }
  0xfe   : > { %v2015_v27 = vrot.slane %v2014_v10, 4  ;;  %v2268_v29 = vrot.slane %v2266_v11, 4  ;;  %v2240_v32 = vrot.slane %v2238_v19, 4  ;;  %vm1115_vm15 = vcmask 64544  }
  0xff   : > { %v2010_v30 = vsel %vm3477_vm14, %v2005_v18, %v2009_v58  ;;  %vm839_vm0 = vcmask 31744   ;;  %v2820_v36 = vrot.slane %v3747_v4, 9  ;;  %v2239_v39 = vsel %vm3451_vm11, %v2815_v13, %v2238_v19 }
 0x100   : > { %v2020_v34 = vsel %vm3477_vm14, %v2015_v27, %v2019_v63  ;;  %v2270_v35 = vsel %vm3451_vm11, %v2268_v29, %v2269_v12  ;;  %v1102_v37 = vpop.permute.xlu1 %1101  ;;  %2145 = vrot.lane.b32.xlu0 %v2807_v55, %s3137_s27  ;;  %2155 = vrot.lane.b32.xlu1 %v2812_v26, %s3137_s27  ;;  %841 = vst.msk [vmem:[#allocation3 + $0x8] sm:$0xff] %vm839_vm0, %v3017_v2  ;;  %840 = vst.msk [vmem:[#allocation3] sm:$0xff] %vm839_vm0, %v3018_v3  ;;  %v2273_v40 = vrot.slane %v2196_v14, 5  ;;  %vm1279_vm1 = vcmask 97344  }
 0x101   : > { %v2808_v56 = vcombine.low %v2010_v30, %v2020_v34  ;;  %v2827_v38 = vcombine.low %v2267_v28, %v2270_v35  ;;  %845 = vst.msk [vmem:[#allocation3 + $0x28] sm:$0xff] %vm839_vm0, %v3019_v5  ;;  %844 = vst.msk [vmem:[#allocation3 + $0x20] sm:$0xff] %vm839_vm0, %v3020_v6  ;;  %v2242_v41 = vsel %vm3451_vm11, %v2240_v32, %v2241_v20  ;;  %v2276_v42 = vrot.slane %v2197_v21, 5 }
 0x102   : > { %846 = vst.msk [vmem:[#allocation3 + $0x30] sm:$0xff] %vm839_vm0, %v3021_v7  ;;  %842 = vst.msk [vmem:[#allocation3 + $0x10] sm:$0xff] %vm839_vm0, %v3022_v8  ;;  %v2816_v52 = vrot.slane %v2183_v22, 9  ;;  %v2245_v44 = vrot.slane %v2184_v23, 5  ;;  %v2274_v45 = vsel %vm3451_vm11, %v2820_v36, %v2273_v40  ;;  %v2275_v1 = vrot.slane %v2273_v40, 4 }
 0x103   : > { %847 = vst.msk [vmem:[#allocation3 + $0x38] sm:$0xff] %vm839_vm0, %v3023_v15  ;;  %843 = vst.msk [vmem:[#allocation3 + $0x18] sm:$0xff] %vm839_vm0, %v3024_v25  ;;  %v2248_v46 = vrot.slane %v2185_v31, 5  ;;  %v2823_v50 = vcombine.low %v2239_v39, %v2242_v41  ;;  %vm1368_vm2 = vcmask 130144   ;;  %vm1641_vm3 = vcmask 162944  }
 0x104   : > { %1117 = vst.msk [vmem:[#allocation3 + $0x8] sm:$0xff] %vm1115_vm15, %v3744_v60  ;;  %1116 = vst.msk [vmem:[#allocation3] sm:$0xff] %vm1115_vm15, %v1092_v33  ;;  %v2247_v47 = vrot.slane %v2245_v44, 4  ;;  %v1353_v48 = vpop.permute.xlu1 %1352  ;;  %2147 = vrot.lane.b32.xlu0 %v2808_v56, %s3137_s27  ;;  %2314 = vrot.lane.b32.xlu1 %v2827_v38, %s3138_s30  ;;  %v2277_v51 = vsel %vm3451_vm11, %v2275_v1, %v2276_v42  ;;  %vm1802_vm4 = vcmask 195744   ;;  %vm1892_vm5 = vcmask 228544   ;;  %s3039_s27 = scalar_lea.vmem %s3038_s17, 4096 }
 0x105   : > { %1121 = vst.msk [vmem:[#allocation3 + $0x28] sm:$0xff] %vm1115_vm15, %v1102_v37  ;;  %v1100_v53 = vpop.permute.xlu0 %1099  ;;  %v2828_v55 = vcombine.low %v2274_v45, %v2277_v51  ;;  %vm2165_vm6 = vcmask 261344   ;;  %vm2326_vm7 = vcmask 294144   ;;  %vm2335_vm8 = vcmask 1047840   ;;  %p3041_p13 = scmp.lt.s32.totalorder %s3039_s27, %s3033_s15 }
 0x106   : > { %1280 = vst.msk [vmem:[#allocation3] sm:$0xff] %vm1279_vm1, %v3705_v16  ;;  %1281 = vst.msk [vmem:[#allocation3 + $0x8] sm:$0xff] %vm1279_vm1, %v3739_v54  ;;  %v2246_v16 = vsel %vm3451_vm11, %v2816_v52, %v2245_v44  ;;  %v2249_v54 = vsel %vm3451_vm11, %v2247_v47, %v2248_v46  ;;  %v3139_v12 = vmov 0  }
 0x107   : > { %1285 = vst.msk [vmem:[#allocation3 + $0x28] sm:$0xff] %vm1279_vm1, %v3711_v24  ;;  %v2824_v57 = vcombine.low %v2246_v16, %v2249_v54  ;;  %p3042_p0 = por %p3041_p13, %p3040_p12 }
 0x108   : > { %1120 = vst.msk [vmem:[#allocation3 + $0x20] sm:$0xff] %vm1115_vm15, %v1100_v53  ;;  %v1355_v24 = vpop.permute.xlu1 %1354  ;;  %2306 = vrot.lane.b32.xlu0 %v2823_v50, %s3138_s30  ;;  %2316 = vrot.lane.b32.xlu1 %v2828_v55, %s3138_s30 }
 0x109   : > { %1284 = vst.msk [vmem:[#allocation3 + $0x20] sm:$0xff] %vm1279_vm1, %v3695_v49  ;;  %v1345_v58 = vpop.permute.xlu0 %1344  ;;  %p3043_p1 = pnand %p3042_p0, %p3036_p11 }
 0x10a   : > { %1373 = vst.msk [vmem:[#allocation3 + $0x20] sm:$0xff] %vm1368_vm2, %v1353_v48  ;;  %1374 = vst.msk [vmem:[#allocation3 + $0x28] sm:$0xff] %vm1368_vm2, %v1355_v24 }
 0x10b   : > { %1369 = vst.msk [vmem:[#allocation3] sm:$0xff] %vm1368_vm2, %v1345_v58 }
 0x10c   : > { %v1626_v43 = vpop.permute.xlu1 %1625  ;;  %2308 = vrot.lane.b32.xlu0 %v2824_v57, %s3138_s30  ;;  %v2829_v57 = vld [vmem:[%s3969_s4] ss:$0 sm:$0xff]  ;;  %s2853_s30 = sshll.u32 %s3111_s21, 4 }
 0x10d   : > { %v1347_v59 = vpop.permute.xlu0 %1346  ;;  %1646 = vst.msk [vmem:[#allocation3 + $0x20] sm:$0xff] %vm1641_vm3, %v1626_v43  ;;  %s2566_s8 = sadd.s32 %s2853_s30, %s2841_s9 }
 0x10e   : > { %1370 = vst.msk [vmem:[#allocation3 + $0x8] sm:$0xff] %vm1368_vm2, %v1347_v59  ;;  %s2842_s21 = sshll.u32 %s2566_s8, 7 }
 0x10f   : > { %s3903_s10 = scalar_lea.hbm %s3970_s5, %s2842_s21 }
 0x111   : > { %v1618_v49 = vpop.permute.xlu0 %1617 }
 0x112   : > { %1642 = vst.msk [vmem:[#allocation3] sm:$0xff] %vm1641_vm3, %v1618_v49  ;;  %v1628_v60 = vpop.permute.xlu1 %1627 }
 0x113   : > { %1647 = vst.msk [vmem:[#allocation3 + $0x28] sm:$0xff] %vm1641_vm3, %v1628_v60 }
 0x115   : > { %v1620_v61 = vpop.permute.xlu0 %1619 }
 0x116   : > { %1643 = vst.msk [vmem:[#allocation3 + $0x8] sm:$0xff] %vm1641_vm3, %v1620_v61  ;;  %v1787_v62 = vpop.permute.xlu1 %1786 }
 0x117   : > { %1807 = vst.msk [vmem:[#allocation3 + $0x20] sm:$0xff] %vm1802_vm4, %v1787_v62 }
 0x119   : > { %v1779_v63 = vpop.permute.xlu0 %1778 }
 0x11a   : > { %1803 = vst.msk [vmem:[#allocation3] sm:$0xff] %vm1802_vm4, %v1779_v63  ;;  %v1789_v0 = vpop.permute.xlu1 %1788 }
 0x11b   : > { %1808 = vst.msk [vmem:[#allocation3 + $0x28] sm:$0xff] %vm1802_vm4, %v1789_v0 }
 0x11d   : > { %v1781_v2 = vpop.permute.xlu0 %1780 }
 0x11e   : > { %1804 = vst.msk [vmem:[#allocation3 + $0x8] sm:$0xff] %vm1802_vm4, %v1781_v2  ;;  %v1877_v3 = vpop.permute.xlu1 %1876 }
 0x11f   : > { %1897 = vst.msk [vmem:[#allocation3 + $0x20] sm:$0xff] %vm1892_vm5, %v1877_v3 }
 0x121   : > { %v1869_v4 = vpop.permute.xlu0 %1868 }
 0x122   : > { %1893 = vst.msk [vmem:[#allocation3] sm:$0xff] %vm1892_vm5, %v1869_v4  ;;  %v1879_v5 = vpop.permute.xlu1 %1878 }
 0x123   : > { %1898 = vst.msk [vmem:[#allocation3 + $0x28] sm:$0xff] %vm1892_vm5, %v1879_v5 }
 0x125   : > { %v1871_v6 = vpop.permute.xlu0 %1870 }
 0x126   : > { %1894 = vst.msk [vmem:[#allocation3 + $0x8] sm:$0xff] %vm1892_vm5, %v1871_v6  ;;  %v2150_v7 = vpop.permute.xlu1 %2149 }
 0x127   : > { %2170 = vst.msk [vmem:[#allocation3 + $0x20] sm:$0xff] %vm2165_vm6, %v2150_v7 }
 0x129   : > { %v2142_v8 = vpop.permute.xlu0 %2141 }
 0x12a   : > { %2166 = vst.msk [vmem:[#allocation3] sm:$0xff] %vm2165_vm6, %v2142_v8  ;;  %v2152_v9 = vpop.permute.xlu1 %2151 }
 0x12b   : > { %2171 = vst.msk [vmem:[#allocation3 + $0x28] sm:$0xff] %vm2165_vm6, %v2152_v9 }
 0x12d   : > { %v2144_v10 = vpop.permute.xlu0 %2143 }
 0x12e   : > { %v2311_v11 = vpop.permute.xlu1 %2310  ;;  %2167 = vst.msk [vmem:[#allocation3 + $0x8] sm:$0xff] %vm2165_vm6, %v2144_v10 }
 0x12f   : > { %2331 = vst.msk [vmem:[#allocation3 + $0x20] sm:$0xff] %vm2326_vm7, %v2311_v11 }
 0x130   : > { %2340 = vst.msk [vmem:[#allocation3 + $0x20] sm:$0xff] %vm2335_vm8, %v3139_v12 }
 0x131   : > { %v2303_v13 = vpop.permute.xlu0 %2302 }
 0x132   : > { %2327 = vst.msk [vmem:[#allocation3] sm:$0xff] %vm2326_vm7, %v2303_v13 }
 0x133   : > { %2336 = vst.msk [vmem:[#allocation3] sm:$0xff] %vm2335_vm8, %v3139_v12 }
 0x136   : > { %v1104_v14 = vpop.permute.xlu1 %1103 }
 0x137   : > { %1122 = vst.msk [vmem:[#allocation3 + $0x30] sm:$0xff] %vm1115_vm15, %v1104_v14  ;;  %v2348_v15 = vld [vmem:[#allocation3 + $0x20] sm:$0xff] }
 0x138   : > { %2894 = vmatprep.mubr.bf16.mxu1 %v2348_v15  ;;  %v1096_v17 = vpop.permute.xlu0 %1095 }
 0x139   : > { %1118 = vst.msk [vmem:[#allocation3 + $0x10] sm:$0xff] %vm1115_vm15, %v1096_v17 }
 0x13a   : > { %v2313_v18 = vpop.permute.xlu1 %2312  ;;  %v2344_v19 = vld [vmem:[#allocation3] sm:$0xff] }
 0x13b   : > { %2332 = vst.msk [vmem:[#allocation3 + $0x28] sm:$0xff] %vm2326_vm7, %v2313_v18  ;;  %2886 = vmatprep.mubr.bf16.mxu0 %v2344_v19 }
 0x13c   : > { %2341 = vst.msk [vmem:[#allocation3 + $0x28] sm:$0xff] %vm2335_vm8, %v3139_v12  ;;  %v2305_v20 = vpop.permute.xlu0 %2304 }
 0x13d   : > { %2328 = vst.msk [vmem:[#allocation3 + $0x8] sm:$0xff] %vm2326_vm7, %v2305_v20 }
 0x13e   : > { %2337 = vst.msk [vmem:[#allocation3 + $0x8] sm:$0xff] %vm2335_vm8, %v3139_v12 }
 0x142   : > { %v1106_v21 = vpop.permute.xlu1 %1105 }
 0x143   : > { %v2349_v22 = vld [vmem:[#allocation3 + $0x28] sm:$0xff]  ;;  %1123 = vst.msk [vmem:[#allocation3 + $0x38] sm:$0xff] %vm1115_vm15, %v1106_v21 }
 0x144   : > { %2895 = vmatmul.mubr.bf16.vlgmr.msra.gmra.mrb[0].mxu1 %v2349_v22 }
 0x145   : > { %v2345_v25 = vld [vmem:[#allocation3 + $0x8] sm:$0xff] }
 0x146   : > { %v1098_v23 = vpop.permute.xlu0 %1097  ;;  %v1268_v26 = vpop.permute.xlu1 %1267  ;;  %2887 = vmatmul.mubr.bf16.vlgmr.msra.gmra.mrb[0].mxu0 %v2345_v25 }
 0x147   : > { %1119 = vst.msk [vmem:[#allocation3 + $0x18] sm:$0xff] %vm1115_vm15, %v1098_v23 }
 0x148   : > { %1286 = vst.msk [vmem:[#allocation3 + $0x30] sm:$0xff] %vm1279_vm1, %v1268_v26 }
 0x14a   : > { %v1260_v27 = vpop.permute.xlu0 %1259  ;;  %v1270_v28 = vpop.permute.xlu1 %1269 }
 0x14b   : > { %1282 = vst.msk [vmem:[#allocation3 + $0x10] sm:$0xff] %vm1279_vm1, %v1260_v27  ;;  %1287 = vst.msk [vmem:[#allocation3 + $0x38] sm:$0xff] %vm1279_vm1, %v1270_v28 }
 0x14e   : > { %v1262_v29 = vpop.permute.xlu0 %1261  ;;  %v1357_v31 = vpop.permute.xlu1 %1356 }
 0x14f   : > { %1283 = vst.msk [vmem:[#allocation3 + $0x18] sm:$0xff] %vm1279_vm1, %v1262_v29 }
 0x150   : > { %1375 = vst.msk [vmem:[#allocation3 + $0x30] sm:$0xff] %vm1368_vm2, %v1357_v31 }
 0x152   : > { %v1349_v30 = vpop.permute.xlu0 %1348  ;;  %v1359_v32 = vpop.permute.xlu1 %1358 }
 0x153   : > { %1371 = vst.msk [vmem:[#allocation3 + $0x10] sm:$0xff] %vm1368_vm2, %v1349_v30  ;;  %1376 = vst.msk [vmem:[#allocation3 + $0x38] sm:$0xff] %vm1368_vm2, %v1359_v32 }
 0x156   : > { %v1351_v33 = vpop.permute.xlu0 %1350  ;;  %v1630_v34 = vpop.permute.xlu1 %1629 }
 0x157   : > { %1372 = vst.msk [vmem:[#allocation3 + $0x18] sm:$0xff] %vm1368_vm2, %v1351_v33 }
 0x158   : > { %1648 = vst.msk [vmem:[#allocation3 + $0x30] sm:$0xff] %vm1641_vm3, %v1630_v34 }
 0x15a   : > { %v1622_v35 = vpop.permute.xlu0 %1621  ;;  %v1632_v36 = vpop.permute.xlu1 %1631 }
 0x15b   : > { %1644 = vst.msk [vmem:[#allocation3 + $0x10] sm:$0xff] %vm1641_vm3, %v1622_v35  ;;  %1649 = vst.msk [vmem:[#allocation3 + $0x38] sm:$0xff] %vm1641_vm3, %v1632_v36 }
 0x15e   : > { %v1624_v37 = vpop.permute.xlu0 %1623  ;;  %v1791_v56 = vpop.permute.xlu1 %1790 }
 0x15f   : > { %1645 = vst.msk [vmem:[#allocation3 + $0x18] sm:$0xff] %vm1641_vm3, %v1624_v37 }
 0x160   : > { %1809 = vst.msk [vmem:[#allocation3 + $0x30] sm:$0xff] %vm1802_vm4, %v1791_v56 }
 0x162   : > { %v1783_v38 = vpop.permute.xlu0 %1782  ;;  %v1793_v39 = vpop.permute.xlu1 %1792 }
 0x163   : > { %1805 = vst.msk [vmem:[#allocation3 + $0x10] sm:$0xff] %vm1802_vm4, %v1783_v38  ;;  %1810 = vst.msk [vmem:[#allocation3 + $0x38] sm:$0xff] %vm1802_vm4, %v1793_v39 }
 0x166   : > { %v1785_v40 = vpop.permute.xlu0 %1784  ;;  %v1881_v41 = vpop.permute.xlu1 %1880 }
 0x167   : > { %1806 = vst.msk [vmem:[#allocation3 + $0x18] sm:$0xff] %vm1802_vm4, %v1785_v40 }
 0x168   : > { %1899 = vst.msk [vmem:[#allocation3 + $0x30] sm:$0xff] %vm1892_vm5, %v1881_v41 }
 0x16a   : > { %v1873_v42 = vpop.permute.xlu0 %1872  ;;  %v1883_v52 = vpop.permute.xlu1 %1882 }
 0x16b   : > { %1895 = vst.msk [vmem:[#allocation3 + $0x10] sm:$0xff] %vm1892_vm5, %v1873_v42  ;;  %1900 = vst.msk [vmem:[#allocation3 + $0x38] sm:$0xff] %vm1892_vm5, %v1883_v52 }
 0x16e   : > { %v1875_v44 = vpop.permute.xlu0 %1874  ;;  %v2154_v45 = vpop.permute.xlu1 %2153 }
 0x16f   : > { %1896 = vst.msk [vmem:[#allocation3 + $0x18] sm:$0xff] %vm1892_vm5, %v1875_v44 }
 0x170   : > { %2172 = vst.msk [vmem:[#allocation3 + $0x30] sm:$0xff] %vm2165_vm6, %v2154_v45 }
 0x172   : > { %v2146_v1 = vpop.permute.xlu0 %2145  ;;  %v2156_v46 = vpop.permute.xlu1 %2155 }
 0x173   : > { %2168 = vst.msk [vmem:[#allocation3 + $0x10] sm:$0xff] %vm2165_vm6, %v2146_v1  ;;  %2173 = vst.msk [vmem:[#allocation3 + $0x38] sm:$0xff] %vm2165_vm6, %v2156_v46 }
 0x176   : > { %v2148_v47 = vpop.permute.xlu0 %2147  ;;  %v2315_v48 = vpop.permute.xlu1 %2314 }
 0x177   : > { %2169 = vst.msk [vmem:[#allocation3 + $0x18] sm:$0xff] %vm2165_vm6, %v2148_v47 }
 0x178   : > { %2333 = vst.msk [vmem:[#allocation3 + $0x30] sm:$0xff] %vm2326_vm7, %v2315_v48 }
 0x179   : > { %2342 = vst.msk [vmem:[#allocation3 + $0x30] sm:$0xff] %vm2335_vm8, %v3139_v12 }
 0x17a   : > { %v2307_v50 = vpop.permute.xlu0 %2306  ;;  %v2317_v51 = vpop.permute.xlu1 %2316 }
 0x17b   : > { %2329 = vst.msk [vmem:[#allocation3 + $0x10] sm:$0xff] %vm2326_vm7, %v2307_v50  ;;  %2334 = vst.msk [vmem:[#allocation3 + $0x38] sm:$0xff] %vm2326_vm7, %v2317_v51 }
 0x17c   : > { %2338 = vst.msk [vmem:[#allocation3 + $0x10] sm:$0xff] %vm2335_vm8, %v3139_v12  ;;  %2343 = vst.msk [vmem:[#allocation3 + $0x38] sm:$0xff] %vm2335_vm8, %v3139_v12 }
 0x17e   : > { %v2309_v53 = vpop.permute.xlu0 %2308 }
 0x17f   : > { %2330 = vst.msk [vmem:[#allocation3 + $0x18] sm:$0xff] %vm2326_vm7, %v2309_v53 }
 0x180   : > { %v2350_v55 = vld [vmem:[#allocation3 + $0x30] sm:$0xff]  ;;  %2339 = vst.msk [vmem:[#allocation3 + $0x18] sm:$0xff] %vm2335_vm8, %v3139_v12 }
 0x181   : > { %2898 = vmatprep.mubr.bf16.mxu1 %v2350_v55 }
 0x183   : > { %v2346_v16 = vld [vmem:[#allocation3 + $0x10] sm:$0xff]  ;;  %v2351_v54 = vld [vmem:[#allocation3 + $0x38] sm:$0xff] }
 0x184   : > { %2890 = vmatprep.mubr.bf16.mxu0 %v2346_v16  ;;  %2899 = vmatmul.mubr.bf16.gmra.mrb[4].mxu1 %v2351_v54 }
 0x187   : > { %v2347_v24 = vld [vmem:[#allocation3 + $0x18] sm:$0xff] }
 0x188   : > { %2891 = vmatmul.mubr.bf16.gmra.mrb[4].mxu0 %v2347_v24 }
 0x217   : > { %v2896_v58 = vpop.f32.mrb[0].mxu1 }
 0x218   : > { %v2498_v43 = vadd.f32 %v2896_v58, %v2829_v57  ;;  %v2489_v59 = vpop.f32.mrb[1].mxu1 }
 0x219   : > { %v2490_v49 = vadd.f32 %v2829_v57, %v2489_v59  ;;  %v2897_v60 = vpop.f32.mrb[2].mxu1  ;;  %v2888_v61 = vpop.f32.mrb[0].mxu0 }
 0x21a   : > { %v2530_v62 = vmax.f32 %v2498_v43, 0.0  ;;  %v2501_v63 = vadd.f32 %v2897_v60, %v2829_v57  ;;  %v2492_v0 = vpop.f32.mrb[3].mxu1  ;;  %v2466_v2 = vadd.f32 %v2888_v61, %v2829_v57  ;;  %v2457_v3 = vpop.f32.mrb[1].mxu0 }
 0x21b   : > { %v2528_v4 = vmax.f32 %v2490_v49, 0.0  ;;  %v2493_v5 = vadd.f32 %v2829_v57, %v2492_v0  ;;  %v2458_v6 = vadd.f32 %v2829_v57, %v2457_v3  ;;  %v2889_v7 = vpop.f32.mrb[2].mxu0 }
 0x21c   : > { %2546 = vst [vmem:[%s3417_s28 + $0x50] sm:$0xff] %v2530_v62  ;;  %v2531_v8 = vmax.f32 %v2501_v63, 0.0  ;;  %v2522_v9 = vmax.f32 %v2466_v2, 0.0  ;;  %v2469_v10 = vadd.f32 %v2889_v7, %v2829_v57  ;;  %v2460_v11 = vpop.f32.mrb[3].mxu0 }
 0x21d   : > { %2544 = vst [vmem:[%s3417_s28 + $0x40] sm:$0xff] %v2528_v4  ;;  %v2529_v12 = vmax.f32 %v2493_v5, 0.0  ;;  %v2520_v13 = vmax.f32 %v2458_v6, 0.0  ;;  %v2461_v14 = vadd.f32 %v2829_v57, %v2460_v11 }
 0x21e   : > { %2547 = vst [vmem:[%s3417_s28 + $0x58] sm:$0xff] %v2531_v8  ;;  %2538 = vst [vmem:[%s3417_s28 + $0x10] sm:$0xff] %v2522_v9  ;;  %v2523_v15 = vmax.f32 %v2469_v10, 0.0 }
 0x21f   : > { %2545 = vst [vmem:[%s3417_s28 + $0x48] sm:$0xff] %v2529_v12  ;;  %2536 = vst [vmem:[%s3417_s28] sm:$0xff] %v2520_v13  ;;  %v2521_v17 = vmax.f32 %v2461_v14, 0.0 }
 0x220   : > { %2539 = vst [vmem:[%s3417_s28 + $0x18] sm:$0xff] %v2523_v15 }
 0x221   : > { %2537 = vst [vmem:[%s3417_s28 + $0x8] sm:$0xff] %v2521_v17 }
 0x257   : > { %v2900_v18 = vpop.f32.mrb[4].mxu1 }
 0x258   : > { %v2514_v19 = vadd.f32 %v2900_v18, %v2829_v57  ;;  %v2505_v20 = vpop.f32.mrb[5].mxu1 }
 0x259   : > { %v2506_v21 = vadd.f32 %v2829_v57, %v2505_v20  ;;  %v2901_v22 = vpop.f32.mrb[6].mxu1 }
 0x25a   : > { %v2534_v23 = vmax.f32 %v2514_v19, 0.0  ;;  %v2517_v25 = vadd.f32 %v2901_v22, %v2829_v57  ;;  %v2508_v26 = vpop.f32.mrb[7].mxu1 }
 0x25b   : > { %v2892_v27 = vpop.f32.mrb[4].mxu0  ;;  %v2532_v28 = vmax.f32 %v2506_v21, 0.0  ;;  %v2509_v29 = vadd.f32 %v2829_v57, %v2508_v26 }
 0x25c   : > { %v2482_v31 = vadd.f32 %v2892_v27, %v2829_v57  ;;  %2550 = vst [vmem:[%s3417_s28 + $0x70] sm:$0xff] %v2534_v23  ;;  %v2473_v30 = vpop.f32.mrb[5].mxu0  ;;  %v2535_v32 = vmax.f32 %v2517_v25, 0.0 }
 0x25d   : > { %v2474_v33 = vadd.f32 %v2829_v57, %v2473_v30  ;;  %2548 = vst [vmem:[%s3417_s28 + $0x60] sm:$0xff] %v2532_v28  ;;  %v2893_v34 = vpop.f32.mrb[6].mxu0  ;;  %v2533_v35 = vmax.f32 %v2509_v29, 0.0 }
 0x25e   : > { %v2526_v36 = vmax.f32 %v2482_v31, 0.0  ;;  %v2485_v37 = vadd.f32 %v2893_v34, %v2829_v57  ;;  %2551 = vst [vmem:[%s3417_s28 + $0x78] sm:$0xff] %v2535_v32  ;;  %v2476_v56 = vpop.f32.mrb[7].mxu0 }
 0x25f   : > { %v2524_v38 = vmax.f32 %v2474_v33, 0.0  ;;  %v2477_v39 = vadd.f32 %v2829_v57, %v2476_v56  ;;  %2549 = vst [vmem:[%s3417_s28 + $0x68] sm:$0xff] %v2533_v35 }
 0x260   : > { %2542 = vst [vmem:[%s3417_s28 + $0x30] sm:$0xff] %v2526_v36  ;;  %v2527_v40 = vmax.f32 %v2485_v37, 0.0 }
 0x261   : > { %2540 = vst [vmem:[%s3417_s28 + $0x20] sm:$0xff] %v2524_v38  ;;  %v2525_v41 = vmax.f32 %v2477_v39, 0.0 }
 0x262   : > { %2543 = vst [vmem:[%s3417_s28 + $0x38] sm:$0xff] %v2527_v40 }
 0x263   : > { %2541 = vst [vmem:[%s3417_s28 + $0x28] sm:$0xff] %v2525_v41 }
 0x264   : > { %3046 = shalt.err (!%p3043_p1)
}
 0x265   : > { %s3047_s28 = scalar_lea.hbm %s3903_s10, 2048  ;;  %s3051_s8 = scalar_lea.hbm %s3970_s5, 8192 }
 0x266   : > { %p3048_p2 = scmp.ne.s32.totalorder %s3903_s10, %s3047_s28  ;;  %p3052_p6 = scmp.lt.u32.totalorder %s3903_s10, %s3970_s5 }
 0x267   : > { %p3053_p7 = scmp.lt.u32.totalorder %s3051_s8, %s3047_s28  ;;  %p3055_p10 = scmp.lt.u32.totalorder %s3047_s28, %s3903_s10 }
 0x268   : > { %p3049_p4 = pnand %p3048_p2, %p3223_p3 }
 0x269   : > { %p3054_p9 = por %p3053_p7, %p3052_p6 }
 0x26a   : > { %p3050_p5 = pneg %p3049_p4 }
 0x26b   : > { %p3056_p11 = por %p3055_p10, %p3054_p9 }
 0x26d   : > { %p3057_p12 = pnand %p3056_p11, %p3050_p5 }
 0x26f   : > { %3060 = shalt.err (!%p3057_p12)
}
 0x270   : > { %s3141_s14 = smov 128  }
 0x271   : > { %2918 = dma.vmem_to_hbm [thread:$0]  (%p3223_p3), %s3906_s22, 2048, %s3903_s10, %s3912_s29, %s3141_s14, %s3141_s14, %s3131_s13  }
 0x272 PF: > { %p2924_p13 = scmp.ge.s32.totalorder %s3127_s25, 2  ;;  %s2584_s16 = sand.u32 1, %s3099_s18  }
 0x273   : > { %s2585_s15 = scalar_lea.sflag [#allocation5], %s2584_s16 }
 0x274   : > { %p2921_p0 = pnand %p2924_p13, %p3232_p8 }
 0x276   : > { %3094 = dma.done.wait (!%p2921_p0), %s2585_s15, 2048  }
 0x277   : > { %3096 = vsyncadd (!%p2921_p0), %s2585_s15, 4294965248  ;;  %s18_s25 = sadd.s32 1, %s3127_s25   ;;  %s3992_s6 = sld [smem:[#allocation7_spill]] }
 0x278   : > { %p15_p1 = scmp.ge.s32.totalorder %s18_s25, 6   ;;  %s3993_s13 = sld [smem:[#allocation8_spill]] }
 0x279   : > { %s3994_s18 = smov %s3103_s19  ;;  %s3995_s19 = smov %s3107_s20 }
 0x27a   : > { %s3996_s20 = smov %s3241_s11  ;;  %s3997_s21 = smov %s3119_s23 }
 0x27b   : > { %s3998_s22 = smov %s3123_s24  ;;  %17 = sbr.rel (!%p15_p1) target bundleno = 5 (0x5), region = 101 }
 0x27d   : > { %s3999_s23 = smov %s3992_s6 }
 0x27e   : > { %s4000_s24 = smov %s3993_s13 }
 0x282   :  { %2590 = vsyncpa [#allocation5], 1 }
 0x283   :  { %2592 = vsyncpa [#allocation5 + $0x1], 1 }

</bundles_post_ra>
